<compile_context>
chip_gen: v7x
topology: tpu7x:2x2x1
jax: 0.10.0
libtpu: 0.0.40
codegen_flags: <defaults>
</compile_context>

<pallas_src>
import functools

import jax
import jax.numpy as jnp
from jax.experimental import pallas as pl
from jax.experimental.pallas import tpu as pltpu


# ----------------------------- Pallas kernel -----------------------------

def _sto_bottleneck_kernel(x_ref, w1_ref, b1_ref, w2_ref, b2_ref, w3_ref, b3_ref,
                           *rest, H, W, stride, has_sc_conv, pad_top):
    i = 0
    if has_sc_conv:
        ws_ref, bs_ref = rest[i], rest[i + 1]
        i += 2
    if stride > 1:
        sel_ref = rest[i]
        i += 1
    o_ref = rest[i]
    h1pad_ref = rest[i + 1]

    HW = H * W
    f32 = jnp.float32
    cdt = x_ref.dtype  # bf16 compute dtype for the MXU
    Pp = w2_ref.shape[-1]

    # ---- conv1 (1x1) + bn1 (folded) + relu -------------------------------
    x = x_ref[...]                                                   # (HW, Cin_p) bf16
    h1 = jnp.dot(x, w1_ref[...], preferred_element_type=f32)
    h1 = jnp.maximum(h1 + b1_ref[...], 0.0)                          # (HW, Pp) f32

    # ---- conv2 (3x3, pad=1) + bn2 (folded) + relu ------------------------
    # 9 shifted dots over a zero-padded flat VMEM scratch; horizontal wrap handled by
    # per-row column masks, vertical out-of-bounds handled by the zero pad bands.
    zpad = jnp.zeros((pad_top, Pp), f32)
    h1pad_ref[pl.ds(0, pad_top), :] = zpad                 # top pad band
    h1pad_ref[pl.ds(pad_top + HW, pad_top), :] = zpad      # bottom pad band
    h1pad_ref[pl.ds(pad_top, HW), :] = h1                  # payload

    col = jax.lax.broadcasted_iota(jnp.int32, (HW, 1), 0) % W
    not_left = (col > 0).astype(cdt)        # output col w==0 cannot read input col w-1
    not_right = (col < W - 1).astype(cdt)   # output col w==W-1 cannot read input col w+1

    acc2 = jnp.zeros((HW, Pp), f32)
    for t in range(9):
        di, dj = divmod(t, 3)
        patch = h1pad_ref[pl.ds(pad_top + (di - 1) * W + (dj - 1), HW), :].astype(cdt)
        if dj == 0:
            patch = patch * not_left
        elif dj == 2:
            patch = patch * not_right
        acc2 = acc2 + jnp.dot(patch, w2_ref[t], preferred_element_type=f32)
    h2 = jnp.maximum(acc2 + b2_ref[...], 0.0)                        # (HW, Pp) f32

    # ---- fused spatial stride subsample (0/1 row-selection matmul) -------
    if stride > 1:
        sel = sel_ref[...]                                           # (Ho*Wo, HW) bf16, 0/1
        h2s = jnp.dot(sel, h2.astype(cdt), preferred_element_type=f32).astype(cdt)
        xs = jnp.dot(sel, x, preferred_element_type=f32).astype(cdt)
    else:
        h2s = h2.astype(cdt)
        xs = x

    # ---- conv3 (1x1) + bn3 (folded) + shortcut + relu --------------------
    out = jnp.dot(h2s, w3_ref[...], preferred_element_type=f32) + b3_ref[...]
    if has_sc_conv:
        out = out + jnp.dot(xs, ws_ref[...], preferred_element_type=f32) + bs_ref[...]
    else:
        out = out + xs.astype(f32)
    o_ref[...] = jnp.maximum(out, 0.0).astype(o_ref.dtype)


# ----------------------------- wrapper -----------------------------

def _round_up(x, m):
    return (x + m - 1) // m * m


def _pad2(a, r, c):
    return jnp.pad(a, ((0, r - a.shape[0]), (0, c - a.shape[1])))


def fold_bn(gamma, beta, mean, var, eps=1e-5):
    scale = gamma / jnp.sqrt(var + eps)
    return scale, beta - mean * scale


def sto_bottleneck_forward(x_nchw, p, stride):
    """Fused Pallas forward of StoBottleneck. Input/output are NCHW (PyTorch convention)."""
    expansion = 4
    N, Cin, H, W = x_nchw.shape
    planes = p["w1_oihw"].shape[0]
    Cout = expansion * planes
    Ho = (H + 2 - 3) // stride + 1
    Wo = (W + 2 - 3) // stride + 1
    HW, HoWo = H * W, Ho * Wo

    LANE = 128
    Cin_p = _round_up(Cin, LANE)
    Pp = _round_up(planes, LANE)
    Cout_p = _round_up(Cout, LANE)
    cdt = jnp.bfloat16

    # activations: NCHW -> (N, H*W, Cin_p), channel-padded, bf16
    x = jnp.transpose(x_nchw, (0, 2, 3, 1)).astype(jnp.float32)
    x = jnp.pad(x, ((0, 0), (0, 0), (0, 0), (0, Cin_p - Cin)))
    x = x.reshape(N, HW, Cin_p).astype(cdt)

    # fold inference-mode BN scale into weight columns; biases stay f32
    s1, b1 = fold_bn(*p["bn1"])
    s2, b2 = fold_bn(*p["bn2"])
    s3, b3 = fold_bn(*p["bn3"])

    w1 = p["w1_oihw"][:, :, 0, 0].T * s1[None, :]                        # (Cin, planes)
    w2 = jnp.transpose(p["w2_oihw"], (2, 3, 1, 0)) * s2[None, None, None, :]  # (3,3,ci,co)
    w2 = w2.reshape(9, planes, planes)
    w3 = p["w3_oihw"][:, :, 0, 0].T * s3[None, :]                        # (planes, Cout)

    w1p = _pad2(w1, Cin_p, Pp).astype(cdt)
    w2p = jnp.pad(w2, ((0, 0), (0, Pp - planes), (0, Pp - planes))).astype(cdt)
    w3p = _pad2(w3, Pp, Cout_p).astype(cdt)
    b1p = _pad2(b1[None, :].astype(jnp.float32), 1, Pp)
    b2p = _pad2(b2[None, :].astype(jnp.float32), 1, Pp)
    b3p = _pad2(b3[None, :].astype(jnp.float32), 1, Cout_p)

    has_sc_conv = (stride != 1) or (Cin != Cout)

    args = [x, w1p, b1p, w2p, b2p, w3p, b3p]
    in_specs = [
        pl.BlockSpec((None, HW, Cin_p), lambda b: (b, 0, 0)),
        pl.BlockSpec((Cin_p, Pp), lambda b: (0, 0)),
        pl.BlockSpec((1, Pp), lambda b: (0, 0)),
        pl.BlockSpec((9, Pp, Pp), lambda b: (0, 0, 0)),
        pl.BlockSpec((1, Pp), lambda b: (0, 0)),
        pl.BlockSpec((Pp, Cout_p), lambda b: (0, 0)),
        pl.BlockSpec((1, Cout_p), lambda b: (0, 0)),
    ]

    if has_sc_conv:
        ss, bs = fold_bn(*p["bns"])
        ws = p["ws_oihw"][:, :, 0, 0].T * ss[None, :]                    # (Cin, Cout)
        args += [_pad2(ws, Cin_p, Cout_p).astype(cdt),
                 _pad2(bs[None, :].astype(jnp.float32), 1, Cout_p)]
        in_specs += [pl.BlockSpec((Cin_p, Cout_p), lambda b: (0, 0)),
                     pl.BlockSpec((1, Cout_p), lambda b: (0, 0))]

    if stride > 1:
        rows = jnp.arange(HoWo)
        src = (stride * (rows // Wo)) * W + stride * (rows % Wo)
        sel = (src[:, None] == jnp.arange(HW)[None, :]).astype(cdt)      # (HoWo, HW) 0/1
        args += [sel]
        in_specs += [pl.BlockSpec((HoWo, HW), lambda b: (0, 0))]

    pad_top = _round_up(W + 1, 8)
    scratch_rows = pad_top + HW + pad_top

    kern = functools.partial(
        _sto_bottleneck_kernel,
        H=H, W=W, stride=stride, has_sc_conv=has_sc_conv, pad_top=pad_top)

    out = pl.pallas_call(
        kern,
        grid=(N,),
        in_specs=in_specs,
        out_specs=pl.BlockSpec((None, HoWo, Cout_p), lambda b: (b, 0, 0)),
        out_shape=jax.ShapeDtypeStruct((N, HoWo, Cout_p), jnp.float32),
        scratch_shapes=[pltpu.VMEM((scratch_rows, Pp), jnp.float32)],
        compiler_params=pltpu.CompilerParams(dimension_semantics=("parallel",)),
    )(*args)

    out = out[:, :, :Cout].reshape(N, Ho, Wo, Cout)
    return jnp.transpose(out, (0, 3, 1, 2))  # back to NCHW


# ----------------------------- reference (pure JAX, f32) -----------------------------

def _conv_ref(x_nhwc, w_oihw, stride, pad):
    w_hwio = jnp.transpose(w_oihw, (2, 3, 1, 0))
    return jax.lax.conv_general_dilated(
        x_nhwc, w_hwio, (stride, stride), [(pad, pad), (pad, pad)],
        dimension_numbers=("NHWC", "HWIO", "NHWC"))


def _bn_ref(x_nhwc, bn, eps=1e-5):
    gamma, beta, mean, var = bn
    return (x_nhwc - mean) / jnp.sqrt(var + eps) * gamma + beta


def sto_bottleneck_ref(x_nchw, p, stride):
    x = jnp.transpose(x_nchw, (0, 2, 3, 1)).astype(jnp.float32)
    Cin = x.shape[-1]
    planes = p["w1_oihw"].shape[0]
    out = jax.nn.relu(_bn_ref(_conv_ref(x, p["w1_oihw"], 1, 0), p["bn1"]))
    out = jax.nn.relu(_bn_ref(_conv_ref(out, p["w2_oihw"], stride, 1), p["bn2"]))
    out = _bn_ref(_conv_ref(out, p["w3_oihw"], 1, 0), p["bn3"])
    if (stride != 1) or (Cin != 4 * planes):
        sc = _bn_ref(_conv_ref(x, p["ws_oihw"], stride, 0), p["bns"])
    else:
        sc = x
    out = jax.nn.relu(out + sc)
    return jnp.transpose(out, (0, 3, 1, 2))


# ----------------------------- main -----------------------------

if __name__ == "__main__":
    key = jax.random.PRNGKey(0)
    in_planes, planes, stride = 16, 8, 2
    batch, H, W = 2, 8, 8
    exp = 4

    ks = jax.random.split(key, 12)
    params = {
        "w1_oihw": 0.2 * jax.random.normal(ks[0], (planes, in_planes, 1, 1), jnp.float32),
        "w2_oihw": 0.1 * jax.random.normal(ks[1], (planes, planes, 3, 3), jnp.float32),
        "w3_oihw": 0.2 * jax.random.normal(ks[2], (exp * planes, planes, 1, 1), jnp.float32),
        "ws_oihw": 0.2 * jax.random.normal(ks[3], (exp * planes, in_planes, 1, 1), jnp.float32),
        # BN params: (gamma, beta, running_mean, running_var)
        "bn1": (1.0 + 0.1 * jax.random.normal(ks[4], (planes,)),
                0.1 * jax.random.normal(ks[5], (planes,)),
                0.1 * jax.random.normal(ks[6], (planes,)),
                1.0 + 0.1 * jax.random.uniform(ks[7], (planes,))),
        "bn2": (jnp.ones((planes,)), jnp.zeros((planes,)),
                jnp.zeros((planes,)), jnp.ones((planes,))),
        "bn3": (1.0 + 0.1 * jax.random.normal(ks[8], (exp * planes,)),
                0.1 * jax.random.normal(ks[9], (exp * planes,)),
                jnp.zeros((exp * planes,)), jnp.ones((exp * planes,))),
        "bns": (jnp.ones((exp * planes,)),
                0.1 * jax.random.normal(ks[10], (exp * planes,)),
                jnp.zeros((exp * planes,)), jnp.ones((exp * planes,))),
    }

    x = jax.random.normal(ks[11], (batch, in_planes, H, W), jnp.float32)  # NCHW input

    fwd = jax.jit(sto_bottleneck_forward, static_argnums=(2,))
    out = jax.block_until_ready(fwd(x, params, stride))
    ref = jax.block_until_ready(sto_bottleneck_ref(x, params, stride))

    assert out.shape == (batch, exp * planes, H // stride, W // stride), out.shape
    # bf16 MXU operands (f32 accumulation) => compare against the f32 reference with a
    # bf16-appropriate tolerance.
    err = float(jnp.max(jnp.abs(out - ref)))
    assert jnp.allclose(out, ref, rtol=5e-2, atol=5e-2), err
    print("KERNEL_OK")
</pallas_src>

<mosaic_0001>
module attributes {stable_mosaic.version = 11 : i64} {
  func.func @_sto_bottleneck_kernel(%arg0: i32, %arg1: memref<1x64x128xbf16, #tpu.memory_space<vmem>>, %arg2: memref<128x128xbf16, #tpu.memory_space<vmem>>, %arg3: memref<1x128xf32, #tpu.memory_space<vmem>>, %arg4: memref<9x128x128xbf16, #tpu.memory_space<vmem>>, %arg5: memref<1x128xf32, #tpu.memory_space<vmem>>, %arg6: memref<128x128xbf16, #tpu.memory_space<vmem>>, %arg7: memref<1x128xf32, #tpu.memory_space<vmem>>, %arg8: memref<128x128xbf16, #tpu.memory_space<vmem>>, %arg9: memref<1x128xf32, #tpu.memory_space<vmem>>, %arg10: memref<16x64xbf16, #tpu.memory_space<vmem>>, %arg11: memref<1x16x128xf32, #tpu.memory_space<vmem>>, %arg12: memref<96x128xf32, #tpu.memory_space<vmem>>) attributes {dimension_semantics = [#tpu.dimension_semantics<parallel>], iteration_bounds = array<i64: 2>, scalar_prefetch = 0 : i64, scratch_operands = 1 : i64, tpu.core_type = #tpu.core_type<tc>, window_params = [{transform_indices = @transform_0, window_bounds = array<i64: 1, 64, 128>}, {pipeline_mode = #tpu.pipeline_mode<synchronous>, transform_indices = @transform_1, window_bounds = array<i64: 128, 128>}, {pipeline_mode = #tpu.pipeline_mode<synchronous>, transform_indices = @transform_2, window_bounds = array<i64: 1, 128>}, {pipeline_mode = #tpu.pipeline_mode<synchronous>, transform_indices = @transform_3, window_bounds = array<i64: 9, 128, 128>}, {pipeline_mode = #tpu.pipeline_mode<synchronous>, transform_indices = @transform_4, window_bounds = array<i64: 1, 128>}, {pipeline_mode = #tpu.pipeline_mode<synchronous>, transform_indices = @transform_5, window_bounds = array<i64: 128, 128>}, {pipeline_mode = #tpu.pipeline_mode<synchronous>, transform_indices = @transform_6, window_bounds = array<i64: 1, 128>}, {pipeline_mode = #tpu.pipeline_mode<synchronous>, transform_indices = @transform_7, window_bounds = array<i64: 128, 128>}, {pipeline_mode = #tpu.pipeline_mode<synchronous>, transform_indices = @transform_8, window_bounds = array<i64: 1, 128>}, {pipeline_mode = #tpu.pipeline_mode<synchronous>, transform_indices = @transform_9, window_bounds = array<i64: 16, 64>}, {transform_indices = @transform_10, window_bounds = array<i64: 1, 16, 128>}]} {
    %c0 = arith.constant 0 : index
    %c0_0 = arith.constant 0 : index
    %c0_1 = arith.constant 0 : index
    %0 = vector.load %arg1[%c0, %c0_0, %c0_1] : memref<1x64x128xbf16, #tpu.memory_space<vmem>>, vector<1x64x128xbf16>
    %1 = vector.shape_cast %0 : vector<1x64x128xbf16> to vector<64x128xbf16>
    %c0_2 = arith.constant 0 : index
    %c0_3 = arith.constant 0 : index
    %2 = vector.load %arg2[%c0_2, %c0_3] : memref<128x128xbf16, #tpu.memory_space<vmem>>, vector<128x128xbf16>
    %cst = arith.constant dense<0.000000e+00> : vector<64x128xf32>
    %3 = tpu.matmul %1, %2, %cst {dimension_numbers = #tpu.dot_dimension_numbers<[1], [0], [0], [1], [0, 0, 1, 1], [], []>} : vector<64x128xbf16>, vector<128x128xbf16>, vector<64x128xf32> -> vector<64x128xf32>
    %c0_4 = arith.constant 0 : index
    %c0_5 = arith.constant 0 : index
    %4 = vector.load %arg3[%c0_4, %c0_5] : memref<1x128xf32, #tpu.memory_space<vmem>>, vector<1x128xf32>
    %5 = vector.broadcast %4 : vector<1x128xf32> to vector<64x128xf32>
    %6 = arith.addf %3, %5 : vector<64x128xf32>
    %cst_6 = arith.constant 0.000000e+00 : f32
    %7 = vector.broadcast %cst_6 : f32 to vector<64x128xf32>
    %8 = arith.maximumf %6, %7 : vector<64x128xf32>
    %cst_7 = arith.constant 0.000000e+00 : f32
    %9 = vector.broadcast %cst_7 : f32 to vector<16x128xf32>
    %c0_8 = arith.constant 0 : index
    %c0_9 = arith.constant 0 : index
    %10 = vector.load %arg12[%c0_8, %c0_9] : memref<96x128xf32, #tpu.memory_space<vmem>>, vector<16x128xf32>
    tpu.vector_store %arg12[%c0_8, %c0_9], %9 {strides = array<i32>} : memref<96x128xf32, #tpu.memory_space<vmem>>, vector<16x128xf32>,
    %c80 = arith.constant 80 : index
    %c0_10 = arith.constant 0 : index
    %11 = vector.load %arg12[%c80, %c0_10] : memref<96x128xf32, #tpu.memory_space<vmem>>, vector<16x128xf32>
    tpu.vector_store %arg12[%c80, %c0_10], %9 {strides = array<i32>} : memref<96x128xf32, #tpu.memory_space<vmem>>, vector<16x128xf32>,
    %c16 = arith.constant 16 : index
    %c0_11 = arith.constant 0 : index
    %12 = vector.load %arg12[%c16, %c0_11] : memref<96x128xf32, #tpu.memory_space<vmem>>, vector<64x128xf32>
    tpu.vector_store %arg12[%c16, %c0_11], %8 {strides = array<i32>} : memref<96x128xf32, #tpu.memory_space<vmem>>, vector<64x128xf32>,
    %13 = tpu.iota {dimensions = array<i32: 0>} : vector<64x1xi32>
    %c8_i32 = arith.constant 8 : i32
    %c0_i32 = arith.constant 0 : i32
    %14 = arith.cmpi eq, %c8_i32, %c0_i32 : i32
    %c1_i32 = arith.constant 1 : i32
    %15 = arith.select %14, %c1_i32, %c8_i32 : i32
    %16 = vector.broadcast %15 : i32 to vector<64x1xi32>
    %17 = arith.remsi %13, %16 : vector<64x1xi32>
    %c0_i32_12 = arith.constant 0 : i32
    %18 = vector.broadcast %c0_i32_12 : i32 to vector<64x1xi32>
    %19 = arith.cmpi ne, %17, %18 : vector<64x1xi32>
    %c0_i32_13 = arith.constant 0 : i32
    %20 = vector.broadcast %c0_i32_13 : i32 to vector<64x1xi32>
    %21 = arith.cmpi slt, %17, %20 : vector<64x1xi32>
    %c0_i32_14 = arith.constant 0 : i32
    %22 = arith.cmpi slt, %15, %c0_i32_14 : i32
    %23 = vector.broadcast %22 : i1 to vector<64x1xi1>
    %24 = vector.broadcast %23 : vector<64x1xi1> to vector<64x1xi1>
    %25 = arith.xori %21, %24 : vector<64x1xi1>
    %26 = arith.andi %25, %19 : vector<64x1xi1>
    %27 = vector.broadcast %15 : i32 to vector<64x1xi32>
    %28 = arith.addi %17, %27 : vector<64x1xi32>
    %29 = arith.select %26, %28, %17 : vector<64x1xi1>, vector<64x1xi32>
    %c0_i32_15 = arith.constant 0 : i32
    %30 = vector.broadcast %c0_i32_15 : i32 to vector<64x1xi32>
    %31 = arith.cmpi sgt, %29, %30 : vector<64x1xi32>
    %32 = arith.extui %31 : vector<64x1xi1> to vector<64x1xi32>
    %33 = arith.sitofp %32 : vector<64x1xi32> to vector<64x1xf32>
    %34 = arith.truncf %33 : vector<64x1xf32> to vector<64x1xbf16>
    %c7_i32 = arith.constant 7 : i32
    %35 = vector.broadcast %c7_i32 : i32 to vector<64x1xi32>
    %36 = arith.cmpi slt, %29, %35 : vector<64x1xi32>
    %37 = arith.extui %36 : vector<64x1xi1> to vector<64x1xi32>
    %38 = arith.sitofp %37 : vector<64x1xi32> to vector<64x1xf32>
    %39 = arith.truncf %38 : vector<64x1xf32> to vector<64x1xbf16>
    %cst_16 = arith.constant 0.000000e+00 : f32
    %40 = vector.broadcast %cst_16 : f32 to vector<64x128xf32>
    %c7 = arith.constant 7 : index
    %c0_17 = arith.constant 0 : index
    %41 = vector.load %arg12[%c7, %c0_17] : memref<96x128xf32, #tpu.memory_space<vmem>>, vector<64x128xf32>
    %42 = arith.truncf %41 : vector<64x128xf32> to vector<64x128xbf16>
    %43 = vector.broadcast %34 : vector<64x1xbf16> to vector<64x128xbf16>
    %44 = arith.mulf %42, %43 : vector<64x128xbf16>
    %c0_18 = arith.constant 0 : index
    %c0_19 = arith.constant 0 : index
    %c0_20 = arith.constant 0 : index
    %45 = vector.load %arg4[%c0_18, %c0_19, %c0_20] : memref<9x128x128xbf16, #tpu.memory_space<vmem>>, vector<1x128x128xbf16>
    %46 = vector.shape_cast %45 : vector<1x128x128xbf16> to vector<128x128xbf16>
    %cst_21 = arith.constant dense<0.000000e+00> : vector<64x128xf32>
    %47 = tpu.matmul %44, %46, %cst_21 {dimension_numbers = #tpu.dot_dimension_numbers<[1], [0], [0], [1], [0, 0, 1, 1], [], []>} : vector<64x128xbf16>, vector<128x128xbf16>, vector<64x128xf32> -> vector<64x128xf32>
    %48 = arith.addf %40, %47 : vector<64x128xf32>
    %c8 = arith.constant 8 : index
    %c0_22 = arith.constant 0 : index
    %49 = vector.load %arg12[%c8, %c0_22] : memref<96x128xf32, #tpu.memory_space<vmem>>, vector<64x128xf32>
    %50 = arith.truncf %49 : vector<64x128xf32> to vector<64x128xbf16>
    %c1 = arith.constant 1 : index
    %c0_23 = arith.constant 0 : index
    %c0_24 = arith.constant 0 : index
    %51 = vector.load %arg4[%c1, %c0_23, %c0_24] : memref<9x128x128xbf16, #tpu.memory_space<vmem>>, vector<1x128x128xbf16>
    %52 = vector.shape_cast %51 : vector<1x128x128xbf16> to vector<128x128xbf16>
    %cst_25 = arith.constant dense<0.000000e+00> : vector<64x128xf32>
    %53 = tpu.matmul %50, %52, %cst_25 {dimension_numbers = #tpu.dot_dimension_numbers<[1], [0], [0], [1], [0, 0, 1, 1], [], []>} : vector<64x128xbf16>, vector<128x128xbf16>, vector<64x128xf32> -> vector<64x128xf32>
    %54 = arith.addf %48, %53 : vector<64x128xf32>
    %c9 = arith.constant 9 : index
    %c0_26 = arith.constant 0 : index
    %55 = vector.load %arg12[%c9, %c0_26] : memref<96x128xf32, #tpu.memory_space<vmem>>, vector<64x128xf32>
    %56 = arith.truncf %55 : vector<64x128xf32> to vector<64x128xbf16>
    %57 = vector.broadcast %39 : vector<64x1xbf16> to vector<64x128xbf16>
    %58 = arith.mulf %56, %57 : vector<64x128xbf16>
    %c2 = arith.constant 2 : index
    %c0_27 = arith.constant 0 : index
    %c0_28 = arith.constant 0 : index
    %59 = vector.load %arg4[%c2, %c0_27, %c0_28] : memref<9x128x128xbf16, #tpu.memory_space<vmem>>, vector<1x128x128xbf16>
    %60 = vector.shape_cast %59 : vector<1x128x128xbf16> to vector<128x128xbf16>
    %cst_29 = arith.constant dense<0.000000e+00> : vector<64x128xf32>
    %61 = tpu.matmul %58, %60, %cst_29 {dimension_numbers = #tpu.dot_dimension_numbers<[1], [0], [0], [1], [0, 0, 1, 1], [], []>} : vector<64x128xbf16>, vector<128x128xbf16>, vector<64x128xf32> -> vector<64x128xf32>
    %62 = arith.addf %54, %61 : vector<64x128xf32>
    %c15 = arith.constant 15 : index
    %c0_30 = arith.constant 0 : index
    %63 = vector.load %arg12[%c15, %c0_30] : memref<96x128xf32, #tpu.memory_space<vmem>>, vector<64x128xf32>
    %64 = arith.truncf %63 : vector<64x128xf32> to vector<64x128xbf16>
    %65 = vector.broadcast %34 : vector<64x1xbf16> to vector<64x128xbf16>
    %66 = arith.mulf %64, %65 : vector<64x128xbf16>
    %c3 = arith.constant 3 : index
    %c0_31 = arith.constant 0 : index
    %c0_32 = arith.constant 0 : index
    %67 = vector.load %arg4[%c3, %c0_31, %c0_32] : memref<9x128x128xbf16, #tpu.memory_space<vmem>>, vector<1x128x128xbf16>
    %68 = vector.shape_cast %67 : vector<1x128x128xbf16> to vector<128x128xbf16>
    %cst_33 = arith.constant dense<0.000000e+00> : vector<64x128xf32>
    %69 = tpu.matmul %66, %68, %cst_33 {dimension_numbers = #tpu.dot_dimension_numbers<[1], [0], [0], [1], [0, 0, 1, 1], [], []>} : vector<64x128xbf16>, vector<128x128xbf16>, vector<64x128xf32> -> vector<64x128xf32>
    %70 = arith.addf %62, %69 : vector<64x128xf32>
    %c16_34 = arith.constant 16 : index
    %c0_35 = arith.constant 0 : index
    %71 = vector.load %arg12[%c16_34, %c0_35] : memref<96x128xf32, #tpu.memory_space<vmem>>, vector<64x128xf32>
    %72 = arith.truncf %71 : vector<64x128xf32> to vector<64x128xbf16>
    %c4 = arith.constant 4 : index
    %c0_36 = arith.constant 0 : index
    %c0_37 = arith.constant 0 : index
    %73 = vector.load %arg4[%c4, %c0_36, %c0_37] : memref<9x128x128xbf16, #tpu.memory_space<vmem>>, vector<1x128x128xbf16>
    %74 = vector.shape_cast %73 : vector<1x128x128xbf16> to vector<128x128xbf16>
    %cst_38 = arith.constant dense<0.000000e+00> : vector<64x128xf32>
    %75 = tpu.matmul %72, %74, %cst_38 {dimension_numbers = #tpu.dot_dimension_numbers<[1], [0], [0], [1], [0, 0, 1, 1], [], []>} : vector<64x128xbf16>, vector<128x128xbf16>, vector<64x128xf32> -> vector<64x128xf32>
    %76 = arith.addf %70, %75 : vector<64x128xf32>
    %c17 = arith.constant 17 : index
    %c0_39 = arith.constant 0 : index
    %77 = vector.load %arg12[%c17, %c0_39] : memref<96x128xf32, #tpu.memory_space<vmem>>, vector<64x128xf32>
    %78 = arith.truncf %77 : vector<64x128xf32> to vector<64x128xbf16>
    %79 = vector.broadcast %39 : vector<64x1xbf16> to vector<64x128xbf16>
    %80 = arith.mulf %78, %79 : vector<64x128xbf16>
    %c5 = arith.constant 5 : index
    %c0_40 = arith.constant 0 : index
    %c0_41 = arith.constant 0 : index
    %81 = vector.load %arg4[%c5, %c0_40, %c0_41] : memref<9x128x128xbf16, #tpu.memory_space<vmem>>, vector<1x128x128xbf16>
    %82 = vector.shape_cast %81 : vector<1x128x128xbf16> to vector<128x128xbf16>
    %cst_42 = arith.constant dense<0.000000e+00> : vector<64x128xf32>
    %83 = tpu.matmul %80, %82, %cst_42 {dimension_numbers = #tpu.dot_dimension_numbers<[1], [0], [0], [1], [0, 0, 1, 1], [], []>} : vector<64x128xbf16>, vector<128x128xbf16>, vector<64x128xf32> -> vector<64x128xf32>
    %84 = arith.addf %76, %83 : vector<64x128xf32>
    %c23 = arith.constant 23 : index
    %c0_43 = arith.constant 0 : index
    %85 = vector.load %arg12[%c23, %c0_43] : memref<96x128xf32, #tpu.memory_space<vmem>>, vector<64x128xf32>
    %86 = arith.truncf %85 : vector<64x128xf32> to vector<64x128xbf16>
    %87 = vector.broadcast %34 : vector<64x1xbf16> to vector<64x128xbf16>
    %88 = arith.mulf %86, %87 : vector<64x128xbf16>
    %c6 = arith.constant 6 : index
    %c0_44 = arith.constant 0 : index
    %c0_45 = arith.constant 0 : index
    %89 = vector.load %arg4[%c6, %c0_44, %c0_45] : memref<9x128x128xbf16, #tpu.memory_space<vmem>>, vector<1x128x128xbf16>
    %90 = vector.shape_cast %89 : vector<1x128x128xbf16> to vector<128x128xbf16>
    %cst_46 = arith.constant dense<0.000000e+00> : vector<64x128xf32>
    %91 = tpu.matmul %88, %90, %cst_46 {dimension_numbers = #tpu.dot_dimension_numbers<[1], [0], [0], [1], [0, 0, 1, 1], [], []>} : vector<64x128xbf16>, vector<128x128xbf16>, vector<64x128xf32> -> vector<64x128xf32>
    %92 = arith.addf %84, %91 : vector<64x128xf32>
    %c24 = arith.constant 24 : index
    %c0_47 = arith.constant 0 : index
    %93 = vector.load %arg12[%c24, %c0_47] : memref<96x128xf32, #tpu.memory_space<vmem>>, vector<64x128xf32>
    %94 = arith.truncf %93 : vector<64x128xf32> to vector<64x128xbf16>
    %c7_48 = arith.constant 7 : index
    %c0_49 = arith.constant 0 : index
    %c0_50 = arith.constant 0 : index
    %95 = vector.load %arg4[%c7_48, %c0_49, %c0_50] : memref<9x128x128xbf16, #tpu.memory_space<vmem>>, vector<1x128x128xbf16>
    %96 = vector.shape_cast %95 : vector<1x128x128xbf16> to vector<128x128xbf16>
    %cst_51 = arith.constant dense<0.000000e+00> : vector<64x128xf32>
    %97 = tpu.matmul %94, %96, %cst_51 {dimension_numbers = #tpu.dot_dimension_numbers<[1], [0], [0], [1], [0, 0, 1, 1], [], []>} : vector<64x128xbf16>, vector<128x128xbf16>, vector<64x128xf32> -> vector<64x128xf32>
    %98 = arith.addf %92, %97 : vector<64x128xf32>
    %c25 = arith.constant 25 : index
    %c0_52 = arith.constant 0 : index
    %99 = vector.load %arg12[%c25, %c0_52] : memref<96x128xf32, #tpu.memory_space<vmem>>, vector<64x128xf32>
    %100 = arith.truncf %99 : vector<64x128xf32> to vector<64x128xbf16>
    %101 = vector.broadcast %39 : vector<64x1xbf16> to vector<64x128xbf16>
    %102 = arith.mulf %100, %101 : vector<64x128xbf16>
    %c8_53 = arith.constant 8 : index
    %c0_54 = arith.constant 0 : index
    %c0_55 = arith.constant 0 : index
    %103 = vector.load %arg4[%c8_53, %c0_54, %c0_55] : memref<9x128x128xbf16, #tpu.memory_space<vmem>>, vector<1x128x128xbf16>
    %104 = vector.shape_cast %103 : vector<1x128x128xbf16> to vector<128x128xbf16>
    %cst_56 = arith.constant dense<0.000000e+00> : vector<64x128xf32>
    %105 = tpu.matmul %102, %104, %cst_56 {dimension_numbers = #tpu.dot_dimension_numbers<[1], [0], [0], [1], [0, 0, 1, 1], [], []>} : vector<64x128xbf16>, vector<128x128xbf16>, vector<64x128xf32> -> vector<64x128xf32>
    %106 = arith.addf %98, %105 : vector<64x128xf32>
    %c0_57 = arith.constant 0 : index
    %c0_58 = arith.constant 0 : index
    %107 = vector.load %arg5[%c0_57, %c0_58] : memref<1x128xf32, #tpu.memory_space<vmem>>, vector<1x128xf32>
    %108 = vector.broadcast %107 : vector<1x128xf32> to vector<64x128xf32>
    %109 = arith.addf %106, %108 : vector<64x128xf32>
    %cst_59 = arith.constant 0.000000e+00 : f32
    %110 = vector.broadcast %cst_59 : f32 to vector<64x128xf32>
    %111 = arith.maximumf %109, %110 : vector<64x128xf32>
    %c0_60 = arith.constant 0 : index
    %c0_61 = arith.constant 0 : index
    %112 = vector.load %arg10[%c0_60, %c0_61] : memref<16x64xbf16, #tpu.memory_space<vmem>>, vector<16x64xbf16>
    %113 = arith.truncf %111 : vector<64x128xf32> to vector<64x128xbf16>
    %cst_62 = arith.constant dense<0.000000e+00> : vector<16x128xf32>
    %114 = tpu.matmul %112, %113, %cst_62 {dimension_numbers = #tpu.dot_dimension_numbers<[1], [0], [0], [1], [0, 0, 1, 1], [], []>} : vector<16x64xbf16>, vector<64x128xbf16>, vector<16x128xf32> -> vector<16x128xf32>
    %115 = arith.truncf %114 : vector<16x128xf32> to vector<16x128xbf16>
    %cst_63 = arith.constant dense<0.000000e+00> : vector<16x128xf32>
    %116 = tpu.matmul %112, %1, %cst_63 {dimension_numbers = #tpu.dot_dimension_numbers<[1], [0], [0], [1], [0, 0, 1, 1], [], []>} : vector<16x64xbf16>, vector<64x128xbf16>, vector<16x128xf32> -> vector<16x128xf32>
    %117 = arith.truncf %116 : vector<16x128xf32> to vector<16x128xbf16>
    %c0_64 = arith.constant 0 : index
    %c0_65 = arith.constant 0 : index
    %118 = vector.load %arg6[%c0_64, %c0_65] : memref<128x128xbf16, #tpu.memory_space<vmem>>, vector<128x128xbf16>
    %cst_66 = arith.constant dense<0.000000e+00> : vector<16x128xf32>
    %119 = tpu.matmul %115, %118, %cst_66 {dimension_numbers = #tpu.dot_dimension_numbers<[1], [0], [0], [1], [0, 0, 1, 1], [], []>} : vector<16x128xbf16>, vector<128x128xbf16>, vector<16x128xf32> -> vector<16x128xf32>
    %c0_67 = arith.constant 0 : index
    %c0_68 = arith.constant 0 : index
    %120 = vector.load %arg7[%c0_67, %c0_68] : memref<1x128xf32, #tpu.memory_space<vmem>>, vector<1x128xf32>
    %121 = vector.broadcast %120 : vector<1x128xf32> to vector<16x128xf32>
    %122 = arith.addf %119, %121 : vector<16x128xf32>
    %c0_69 = arith.constant 0 : index
    %c0_70 = arith.constant 0 : index
    %123 = vector.load %arg8[%c0_69, %c0_70] : memref<128x128xbf16, #tpu.memory_space<vmem>>, vector<128x128xbf16>
    %cst_71 = arith.constant dense<0.000000e+00> : vector<16x128xf32>
    %124 = tpu.matmul %117, %123, %cst_71 {dimension_numbers = #tpu.dot_dimension_numbers<[1], [0], [0], [1], [0, 0, 1, 1], [], []>} : vector<16x128xbf16>, vector<128x128xbf16>, vector<16x128xf32> -> vector<16x128xf32>
    %125 = arith.addf %122, %124 : vector<16x128xf32>
    %c0_72 = arith.constant 0 : index
    %c0_73 = arith.constant 0 : index
    %126 = vector.load %arg9[%c0_72, %c0_73] : memref<1x128xf32, #tpu.memory_space<vmem>>, vector<1x128xf32>
    %127 = vector.broadcast %126 : vector<1x128xf32> to vector<16x128xf32>
    %128 = arith.addf %125, %127 : vector<16x128xf32>
    %cst_74 = arith.constant 0.000000e+00 : f32
    %129 = vector.broadcast %cst_74 : f32 to vector<16x128xf32>
    %130 = arith.maximumf %128, %129 : vector<16x128xf32>
    %c0_75 = arith.constant 0 : index
    %c0_76 = arith.constant 0 : index
    %c0_77 = arith.constant 0 : index
    %131 = vector.load %arg11[%c0_75, %c0_76, %c0_77] : memref<1x16x128xf32, #tpu.memory_space<vmem>>, vector<1x16x128xf32>
    %132 = vector.shape_cast %131 : vector<1x16x128xf32> to vector<16x128xf32>
    %133 = vector.shape_cast %130 : vector<16x128xf32> to vector<1x16x128xf32>
    tpu.vector_store %arg11[%c0_75, %c0_76, %c0_77], %133 {strides = array<i32>} : memref<1x16x128xf32, #tpu.memory_space<vmem>>, vector<1x16x128xf32>,
    return
  }
  func.func @transform_0(%arg0: i32) -> (i32, i32, i32) {
    %c0_i32 = arith.constant 0 : i32
    %c0_i32_0 = arith.constant 0 : i32
    %c0_i32_1 = arith.constant 0 : i32
    return %arg0, %c0_i32, %c0_i32_0 : i32, i32, i32
  }
  func.func @transform_1(%arg0: i32) -> (i32, i32) {
    %c0_i32 = arith.constant 0 : i32
    %c0_i32_0 = arith.constant 0 : i32
    %c0_i32_1 = arith.constant 0 : i32
    return %c0_i32, %c0_i32_0 : i32, i32
  }
  func.func @transform_2(%arg0: i32) -> (i32, i32) {
    %c0_i32 = arith.constant 0 : i32
    %c0_i32_0 = arith.constant 0 : i32
    %c0_i32_1 = arith.constant 0 : i32
    return %c0_i32, %c0_i32_0 : i32, i32
  }
  func.func @transform_3(%arg0: i32) -> (i32, i32, i32) {
    %c0_i32 = arith.constant 0 : i32
    %c0_i32_0 = arith.constant 0 : i32
    %c0_i32_1 = arith.constant 0 : i32
    %c0_i32_2 = arith.constant 0 : i32
    return %c0_i32, %c0_i32_0, %c0_i32_1 : i32, i32, i32
  }
  func.func @transform_4(%arg0: i32) -> (i32, i32) {
    %c0_i32 = arith.constant 0 : i32
    %c0_i32_0 = arith.constant 0 : i32
    %c0_i32_1 = arith.constant 0 : i32
    return %c0_i32, %c0_i32_0 : i32, i32
  }
  func.func @transform_5(%arg0: i32) -> (i32, i32) {
    %c0_i32 = arith.constant 0 : i32
    %c0_i32_0 = arith.constant 0 : i32
    %c0_i32_1 = arith.constant 0 : i32
    return %c0_i32, %c0_i32_0 : i32, i32
  }
  func.func @transform_6(%arg0: i32) -> (i32, i32) {
    %c0_i32 = arith.constant 0 : i32
    %c0_i32_0 = arith.constant 0 : i32
    %c0_i32_1 = arith.constant 0 : i32
    return %c0_i32, %c0_i32_0 : i32, i32
  }
  func.func @transform_7(%arg0: i32) -> (i32, i32) {
    %c0_i32 = arith.constant 0 : i32
    %c0_i32_0 = arith.constant 0 : i32
    %c0_i32_1 = arith.constant 0 : i32
    return %c0_i32, %c0_i32_0 : i32, i32
  }
  func.func @transform_8(%arg0: i32) -> (i32, i32) {
    %c0_i32 = arith.constant 0 : i32
    %c0_i32_0 = arith.constant 0 : i32
    %c0_i32_1 = arith.constant 0 : i32
    return %c0_i32, %c0_i32_0 : i32, i32
  }
  func.func @transform_9(%arg0: i32) -> (i32, i32) {
    %c0_i32 = arith.constant 0 : i32
    %c0_i32_0 = arith.constant 0 : i32
    %c0_i32_1 = arith.constant 0 : i32
    return %c0_i32, %c0_i32_0 : i32, i32
  }
  func.func @transform_10(%arg0: i32) -> (i32, i32, i32) {
    %c0_i32 = arith.constant 0 : i32
    %c0_i32_0 = arith.constant 0 : i32
    %c0_i32_1 = arith.constant 0 : i32
    return %arg0, %c0_i32, %c0_i32_0 : i32, i32, i32
  }
}

</mosaic_0001>

<bundles_post_ra>
// kernel: sto_bottleneck_forward.1
= control target key start
LH: loop header
LB: loop body
LE: loop exit
PB: predicated region body
PF: predicated region fallthrough
CT: control target
= control target key end

     0   :  { %15 = vsyncpa [#allocation4], 0  ;;  %s4331_s0 = inlined_call_operand.vmem [shape: bf16[2,64,128], index: 0, kind: input, shape index: {}]   ;;  %s4332_s1 = inlined_call_operand.vmem [shape: bf16[128,128], index: 1, kind: input, shape index: {}]   ;;  %s4333_s2 = inlined_call_operand.vmem [shape: f32[1,128], index: 2, kind: input, shape index: {}]   ;;  %s4334_s3 = inlined_call_operand.vmem [shape: bf16[9,128,128], index: 3, kind: input, shape index: {}]   ;;  %s4335_s4 = inlined_call_operand.vmem [shape: f32[1,128], index: 4, kind: input, shape index: {}]   ;;  %s4336_s5 = inlined_call_operand.vmem [shape: bf16[128,128], index: 5, kind: input, shape index: {}]   ;;  %s4337_s6 = inlined_call_operand.vmem [shape: f32[1,128], index: 6, kind: input, shape index: {}]   ;;  %s4338_s7 = inlined_call_operand.vmem [shape: bf16[128,128], index: 7, kind: input, shape index: {}]   ;;  %s4339_s8 = inlined_call_operand.vmem [shape: f32[1,128], index: 8, kind: input, shape index: {}]   ;;  %s4340_s9 = inlined_call_operand.vmem [shape: bf16[16,64], index: 9, kind: input, shape index: {}]   ;;  %s4341_s10 = inlined_call_operand.hbm [shape: f32[2,16,128], index: 10, kind: output, shape index: {}]  }
   0x1   :  { %17 = vsyncpa [#allocation4 + $0x1], 0  ;;  %s3545_s13 = smov 0   ;;  %s3547_s14 = smov 0  }
   0x2   :  { %s3549_s15 = smov 0   ;;  %s3551_s16 = smov 0  }
   0x3 LB: > { %s3566_s17 = sadd.s32 4294967295, %s3483_s16   ;;  %s2495_s18 = sadd.s32 4294967294, %s3483_s16   ;;  %s3483_s16 = sphi %s3551_s16, %s4373_s16   ;;  %s3479_s15 = sphi %s3549_s15, %s4372_s15   ;;  %s3475_s14 = sphi %s3547_s14, %s4371_s14   ;;  %s3471_s13 = sphi %s3545_s13, %s4370_s13  }
   0x4   : > { %s3570_s19 = sadd.s32 1, %s3483_s16   ;;  %s245_s20 = sadd.s32 1, %s3479_s15 }
   0x5   : > { %s242_s21 = ssub.s32 %s3483_s16, %s3570_s19  ;;  %p255_p0 = scmp.ne.s32.totalorder %s3479_s15, %s3475_s14 }
   0x6   : > { %p243_p1 = scmp.eq.s32.totalorder %s242_s21, 0  ;;  %p256_p2 = scmp.eq.s32.totalorder %s3566_s17, 1 }
   0x7   : > { %p261_p3 = scmp.ne.s32.totalorder %s3475_s14, %s3471_s13  ;;  %p262_p4 = scmp.eq.s32.totalorder %s2495_s18, 1 }
   0x8   : > { %s3581_s22 = scalar_select %p243_p1, %s3479_s15, %s245_s20  }
   0x9   : > { %p3583_p5 = por %p256_p2, %p255_p0  ;;  %p3587_p6 = por %p262_p4, %p261_p3 }
   0xa   : > { %p2498_p7 = scmp.ge.s32.totalorder %s3483_s16, 1  ;;  %p315_p8 = scmp.lt.s32.totalorder %s3483_s16, 3 }
   0xc   : > { %p316_p9 = pnand %p2498_p7, %p315_p8 }
   0xd   : > { %v3319_v0 = vld [vmem:[%s4332_s1] sm:$0xff] (!%p316_p9)   ;;  %p353_p10 = scmp.lt.s32.totalorder (!%p316_p9), %s3566_s17, 1  ;;  %v3320_v1 = vld [vmem:[%s4332_s1 + $0x8] sm:$0xff] (!%p316_p9)   ;;  %v3321_v2 = vld [vmem:[%s4332_s1 + $0x10] sm:$0xff] (!%p316_p9)   ;;  %v3485_v26 = vmov (!%p316_p9), 0.0   ;;  %v547_v31 = vlaneseq (!%p316_p9)  ;;  %s2759_s26 = sshll.u32 (!%p316_p9), %s3566_s17, 8 }
   0xe   : > { %319 = sbr.rel (%p316_p9) target bundleno = 1160 (0x488), region = 60  ;;  %2908 = vmatprep.subr.bf16.mxu0 (!%p316_p9), %v3319_v0  ;;  %v3322_v3 = vld [vmem:[%s4332_s1 + $0x18] sm:$0xff] (!%p316_p9)   ;;  %v3323_v5 = vld [vmem:[%s4332_s1 + $0x20] sm:$0xff] (!%p316_p9)   ;;  %v3334_v7 = vld [vmem:[%s4334_s3 + $0xc8] sm:$0xff] (!%p316_p9)   ;;  %536 = vst [vmem:[#allocation2 + $0x8] sm:$0xff] (!%p316_p9), %v3485_v26  ;;  %s4288_s30 = scalar_lea.hbm (!%p316_p9), %s4341_s10, %s2759_s26 }
   0xf   : > { %2909 = vmatpush3.bf16.msra.mxu0 (!%p316_p9), %v3319_v0  ;;  %v3332_v6 = vld [vmem:[%s4334_s3 + $0xc0] sm:$0xff] (!%p316_p9)   ;;  %v3324_v8 = vld [vmem:[%s4332_s1 + $0x28] sm:$0xff] (!%p316_p9)   ;;  %v3336_v9 = vld [vmem:[%s4334_s3 + $0xd0] sm:$0xff] (!%p316_p9)   ;;  %535 = vst [vmem:[#allocation2] sm:$0xff] (!%p316_p9), %v3485_v26  ;;  %v548_v32 = vshrl.u32 (!%p316_p9), %v547_v31, 7 }
  0x10   : > { %2910 = vmatprep.subr.bf16.mxu0 (!%p316_p9), %v3320_v1  ;;  %3004 = vmatprep.subr.bf16.mxu1 (!%p316_p9), %v3332_v6  ;;  %v3325_v10 = vld [vmem:[%s4332_s1 + $0x30] sm:$0xff] (!%p316_p9)   ;;  %v3326_v11 = vld [vmem:[%s4332_s1 + $0x38] sm:$0xff] (!%p316_p9)   ;;  %v3331_v12 = vld [vmem:[%s4334_s3 + $0x40] sm:$0xff] (!%p316_p9)   ;;  %537 = vst [vmem:[#allocation2 + $0x50] sm:$0xff] (!%p316_p9), %v3485_v26 }
  0x11   : > { %3005 = vmatpush3.bf16.msra.mxu1 (!%p316_p9), %v3332_v6  ;;  %v3333_v15 = vld [vmem:[%s4334_s3 + $0x48] sm:$0xff] (!%p316_p9)   ;;  %v3335_v16 = vld [vmem:[%s4334_s3 + $0x50] sm:$0xff] (!%p316_p9)   ;;  %v3337_v18 = vld [vmem:[%s4334_s3 + $0x58] sm:$0xff] (!%p316_p9)   ;;  %538 = vst [vmem:[#allocation2 + $0x58] sm:$0xff] (!%p316_p9), %v3485_v26  ;;  %v549_v33 = vadd.s32 (!%p316_p9), 8, %v548_v32  ;;  %v560_v35 = vand.u32 (!%p316_p9), 7, %v548_v32 }
  0x12   : > { %3006 = vmatprep.subr.bf16.mxu1 (!%p316_p9), %v3334_v7  ;;  %v3339_v19 = vld [vmem:[%s4334_s3 + $0x60] sm:$0xff] (!%p316_p9)   ;;  %v3341_v20 = vld [vmem:[%s4334_s3 + $0x68] sm:$0xff] (!%p316_p9)   ;;  %v3338_v21 = vld [vmem:[%s4334_s3 + $0xd8] sm:$0xff] (!%p316_p9)   ;;  %v3704_v36 = vadd.s32 (!%p316_p9), 16, %v548_v32  ;;  %v3706_v37 = vadd.s32 (!%p316_p9), 24, %v548_v32  ;;  %v3727_v56 = vadd.s32 (!%p316_p9), 32, %v548_v32 }
  0x13   : > { %2911 = vmatpush3.bf16.msra.mxu0 (!%p316_p9), %v3320_v1  ;;  %v3343_v22 = vld [vmem:[%s4334_s3 + $0x70] sm:$0xff] (!%p316_p9)   ;;  %v3340_v23 = vld [vmem:[%s4334_s3 + $0xe0] sm:$0xff] (!%p316_p9)   ;;  %v3345_v24 = vld [vmem:[%s4334_s3 + $0x78] sm:$0xff] (!%p316_p9)   ;;  %v567_v41 = vand.u32 (!%p316_p9), 7, %v549_v33  ;;  %vm652_vm0 = vcmp.gt.s32.totalorder (!%p316_p9), %v560_v35, 0  ;;  %v3740_v59 = vadd.s32 (!%p316_p9), 48, %v548_v32 }
  0x14   : > { %2912 = vmatprep.subr.bf16.mxu0 (!%p316_p9), %v3321_v2  ;;  %v3342_v25 = vld [vmem:[%s4334_s3 + $0xe8] sm:$0xff] (!%p316_p9)   ;;  %v3686_v27 = vld [vmem:[%s4334_s3] sm:$0xff] (!%p316_p9)   ;;  %v3344_v28 = vld [vmem:[%s4334_s3 + $0xf0] sm:$0xff] (!%p316_p9)   ;;  %v574_v47 = vand.u32 (!%p316_p9), 7, %v3704_v36  ;;  %v581_v48 = vand.u32 (!%p316_p9), 7, %v3706_v37  ;;  %v2515_v55 = vsel (!%p316_p9), %vm652_vm0, 1.0, %v3485_v26 }
  0x15   : > { %s354_s29 = scalar_select %p353_p10, %s3566_s17, 1  ;;  %3007 = vmatpush3.bf16.msra.mxu1 %v3334_v7  ;;  %v3346_v29 = vld [vmem:[%s4334_s3 + $0xf8] sm:$0xff]   ;;  %v3698_v30 = vld [vmem:[%s4334_s3 + $0x100] sm:$0xff]   ;;  %vm3717_vm1 = vcmp.gt.s32.totalorder %v567_v41, 0  ;;  %v3349_v63 = vld [vmem:[%s4334_s3 + $0x8] sm:$0xff]   ;;  %v3752_v0 = vadd.s32 56, %v548_v32 }
  0x16   : > { %3008 = vmatprep.subr.bf16.mxu1 %v3336_v9  ;;  %v2502_v34 = vld [vmem:[%s4333_s2] ss:$0 sm:$0xff]  ;;  %vm3730_vm2 = vcmp.gt.s32.totalorder %v574_v47, 0  ;;  %vm3736_vm3 = vcmp.gt.s32.totalorder %v581_v48, 0  ;;  %vm3756_vm4 = vcmp.lt.s32.totalorder %v560_v35, 7  ;;  %v3763_v6 = vadd.s32 40, %v548_v32 }
  0x17   : > { %s2758_s12 = sshll.u32 %s354_s29, 5  ;;  %2913 = vmatpush3.bf16.msra.mxu0 %v3321_v2  ;;  %vm3765_vm5 = vcmp.lt.s32.totalorder %v567_v41, 7  ;;  %vm3798_vm6 = vcmp.lt.s32.totalorder %v574_v47, 7  ;;  %vm3851_vm10 = vcmp.lt.s32.totalorder %v581_v48, 7  ;;  %v3350_v2 = vld [vmem:[%s4334_s3 + $0x108] sm:$0xff]   ;;  %vm3486_vm0 = vmmov 0  }
  0x18   : > { %s3607_s21 = scalar_lea.vmem %s4331_s0, %s2758_s12  ;;  %2914 = vmatprep.subr.bf16.mxu0 %v3322_v3  ;;  %v595_v33 = vand.u32 7, %v3763_v6  ;;  %s350_s29 = sand.u32 1, %s3475_s14  }
  0x19   : > { %v3327_v4 = vld [vmem:[%s3607_s21] sm:$0xff]   ;;  %3009 = vmatpush3.bf16.msra.mxu1 %v3336_v9  ;;  %v3638_v13 = vld [vmem:[%s3607_s21 + $0x8] sm:$0xff]   ;;  %v3641_v14 = vld [vmem:[%s3607_s21 + $0x10] sm:$0xff]   ;;  %s2499_s12 = sshll.u32 %s350_s29, 4  ;;  %s4290_s11 = scalar_lea.sflag [#allocation4], %s350_s29 }
  0x1a   : > { %2924 = vmatprep.mubr.bf16.mxu0 %v3327_v4  ;;  %v3652_v17 = vld [vmem:[%s3607_s21 + $0x18] sm:$0xff]   ;;  %3010 = vmatprep.subr.bf16.mxu1 %v3338_v21  ;;  %vm657_vm11 = vcmp.gt.s32.totalorder %v595_v33, 0  ;;  %vm3893_vm15 = vcmp.lt.s32.totalorder %v595_v33, 7  ;;  %s3487_s17 = smov [#allocation3]  }
  0x1b   : > { %2915 = vmatpush3.bf16.msra.mxu0 %v3322_v3  ;;  %v2520_v7 = vsel %vm657_vm11, 1.0, %v3485_v26  ;;  %s3425_s18 = sshll.u32 %s3487_s17, 4  ;;  %s3426_s18 = int_to_ptr.vmem [resolvable:$false] %s3425_s18 }
  0x1c   : > { %2916 = vmatprep.subr.bf16.mxu0 %v3323_v5  ;;  %s3427_s20 = scalar_lea.vmem %s3426_s18, 512 }
  0x1d   : > { %3011 = vmatpush3.bf16.msra.mxu1 %v3338_v21  ;;  %v2523_v21 = vsel %vm3756_vm4, 1.0, %v3485_v26 }
  0x1e   : > { %3012 = vmatprep.subr.bf16.mxu1 %v3340_v23 }
  0x1f   : > { %2917 = vmatpush3.bf16.msra.mxu0 %v3323_v5  ;;  %v2516_v5 = vsel %vm3717_vm1, 1.0, %v3485_v26  ;;  %vm2099_vm1 = vcmask 523264  }
  0x20   : > { %2918 = vmatprep.subr.bf16.mxu0 %v3324_v8 }
  0x21   : > { %3013 = vmatpush3.bf16.msra.mxu1 %v3340_v23 }
  0x22   : > { %3014 = vmatprep.subr.bf16.mxu1 %v3342_v25 }
  0x23   : > { %2919 = vmatpush3.bf16.msra.mxu0 %v3324_v8 }
  0x24   : > { %2920 = vmatprep.subr.bf16.mxu0 %v3325_v10 }
  0x25   : > { %3015 = vmatpush3.bf16.msra.mxu1 %v3342_v25  ;;  %v609_v25 = vand.u32 7, %v3752_v0 }
  0x26   : > { %3016 = vmatprep.subr.bf16.mxu1 %v3344_v28 }
  0x27   : > { %2921 = vmatpush3.bf16.msra.mxu0 %v3325_v10  ;;  %v2517_v10 = vsel %vm3730_vm2, 1.0, %v3485_v26  ;;  %vm659_vm9 = vcmp.gt.s32.totalorder %v609_v25, 0  ;;  %vm3879_vm13 = vcmp.lt.s32.totalorder %v609_v25, 7 }
  0x28   : > { %2922 = vmatprep.subr.bf16.mxu0 %v3326_v11 }
  0x29   : > { %3017 = vmatpush3.bf16.msra.mxu1 %v3344_v28 }
  0x2a   : > { %3018 = vmatprep.subr.bf16.mxu1 %v3346_v29 }
  0x2b   : > { %2923 = vmatpush3.bf16.msra.mxu0 %v3326_v11  ;;  %v2518_v11 = vsel %vm3736_vm3, 1.0, %v3485_v26 }
  0x2c   : > { %2932 = vmatprep.subr.bf16.mxu0 %v3331_v12  ;;  %v3806_v35 = vpack.c.bf16 %v2518_v11, %v2517_v10 }
  0x2d   : > { %3019 = vmatpush3.bf16.msra.mxu1 %v3346_v29  ;;  %v3796_v29 = vpack.c.bf16 %v2516_v5, %v2515_v55  ;;  %v3353_v55 = vld [vmem:[%s4334_s3 + $0x18] sm:$0xff]  }
  0x2e   : > { %2925 = vmatmul.mubr.bf16.vlgmr.msra.gmra.mrb[0].mxu0 %v3638_v13  ;;  %3028 = vmatprep.subr.bf16.mxu1 %v3698_v30 }
  0x2f   : > { %2928 = vmatprep.mubr.bf16.mxu0 %v3641_v14  ;;  %2933 = vmatpush3.bf16.msra.mxu0 %v3331_v12  ;;  %v588_v12 = vand.u32 7, %v3727_v56  ;;  %v2525_v56 = vsel %vm3798_vm6, 1.0, %v3485_v26 }
  0x30   : > { %2934 = vmatprep.subr.bf16.mxu0 %v3333_v15 }
  0x31   : > { %vm3821_vm7 = vcmp.gt.s32.totalorder %v588_v12, 0  ;;  %vm3889_vm14 = vcmp.lt.s32.totalorder %v588_v12, 7 }
  0x32   : > { %v2519_v37 = vsel %vm3821_vm7, 1.0, %v3485_v26  ;;  %v2527_v33 = vsel %vm3889_vm14, 1.0, %v3485_v26 }
  0x33   : > { %2935 = vmatpush3.bf16.msra.mxu0 %v3333_v15 }
  0x34   : > { %2936 = vmatprep.subr.bf16.mxu0 %v3335_v16 }
  0x36   : > { %2929 = vmatmul.mubr.bf16.gmra.mrb[4].mxu0 %v3652_v17 }
  0x37   : > { %2937 = vmatpush3.bf16.msra.mxu0 %v3335_v16 }
  0x38   : > { %2938 = vmatprep.subr.bf16.mxu0 %v3337_v18 }
  0x3b   : > { %2939 = vmatpush3.bf16.msra.mxu0 %v3337_v18 }
  0x3c   : > { %2940 = vmatprep.subr.bf16.mxu0 %v3339_v19 }
  0x3f   : > { %2941 = vmatpush3.bf16.msra.mxu0 %v3339_v19  ;;  %v708_v19 = vld [vmem:[#allocation2 + $0x7] sm:$0xff] }
  0x40   : > { %2942 = vmatprep.subr.bf16.mxu0 %v3341_v20 }
  0x43   : > { %2943 = vmatpush3.bf16.msra.mxu0 %v3341_v20  ;;  %v602_v20 = vand.u32 7, %v3740_v59 }
  0x44   : > { %2944 = vmatprep.subr.bf16.mxu0 %v3343_v22 }
  0x45   : > { %vm3825_vm8 = vcmp.gt.s32.totalorder %v602_v20, 0  ;;  %vm3875_vm12 = vcmp.lt.s32.totalorder %v602_v20, 7 }
  0x47   : > { %2945 = vmatpush3.bf16.msra.mxu0 %v3343_v22 }
  0x48   : > { %2946 = vmatprep.subr.bf16.mxu0 %v3345_v24 }
  0x4b   : > { %2947 = vmatpush3.bf16.msra.mxu0 %v3345_v24  ;;  %v3351_v24 = vld [vmem:[%s4334_s3 + $0x10] sm:$0xff]  }
  0x4c   : > { %2956 = vmatprep.subr.bf16.mxu0 %v3686_v27 }
 0x101   : > { %v2926_v38 = vpop.f32.mrb[0].mxu0 }
 0x102   : > { %v505_v39 = vadd.f32 %v2926_v38, %v2502_v34  ;;  %v496_v40 = vpop.f32.mrb[1].mxu0 }
 0x103   : > { %v497_v42 = vadd.f32 %v2502_v34, %v496_v40  ;;  %v2927_v43 = vpop.f32.mrb[2].mxu0 }
 0x104   : > { %v3708_v44 = vmax.f32 %v505_v39, 0.0  ;;  %v508_v45 = vadd.f32 %v2927_v43, %v2502_v34  ;;  %v499_v46 = vpop.f32.mrb[3].mxu0 }
 0x105   : > { %v3712_v49 = vmax.f32 %v497_v42, 0.0  ;;  %v500_v50 = vadd.f32 %v2502_v34, %v499_v46 }
 0x106   : > { %541 = vst [vmem:[#allocation2 + $0x20] sm:$0xff] %v3708_v44  ;;  %v3715_v51 = vmax.f32 %v508_v45, 0.0 }
 0x107   : > { %539 = vst [vmem:[#allocation2 + $0x10] sm:$0xff] %v3712_v49  ;;  %v3722_v53 = vmax.f32 %v500_v50, 0.0  ;;  %v748_v54 = vpack.c.bf16 %v3712_v49, %v3485_v26 }
 0x108   : > { %542 = vst [vmem:[#allocation2 + $0x28] sm:$0xff] %v3715_v51  ;;  %v1312_v60 = vpack.c.bf16 %v3715_v51, %v3708_v44 }
 0x109   : > { %540 = vst [vmem:[#allocation2 + $0x18] sm:$0xff] %v3722_v53  ;;  %v2930_v61 = vpop.f32.mrb[4].mxu0  ;;  %2948 = vmatprep.mubr.bf16.mxu0 %v748_v54  ;;  %v3747_v62 = vpack.c.bf16 %v3708_v44, %v3722_v53  ;;  %v1311_v1 = vpack.c.bf16 %v3722_v53, %v3712_v49  ;;  %v3358_v49 = vld [vmem:[%s4334_s3 + $0x128] sm:$0xff]  }
 0x10a   : > { %v521_v3 = vadd.f32 %v2930_v61, %v2502_v34  ;;  %v512_v4 = vpop.f32.mrb[5].mxu0  ;;  %v3373_v44 = vld [vmem:[%s4334_s3 + $0xa8] sm:$0xff]  }
 0x10b   : > { %v513_v8 = vadd.f32 %v2502_v34, %v512_v4  ;;  %v2931_v9 = vpop.f32.mrb[6].mxu0  ;;  %2949 = vmatmul.mubr.bf16.vlgmr.msra.gmra.mrb[8].mxu0 %v3747_v62  ;;  %v2522_v4 = vsel %vm659_vm9, 1.0, %v3485_v26 }
 0x10c   : > { %v3777_v15 = vmax.f32 %v521_v3, 0.0  ;;  %v524_v16 = vadd.f32 %v2931_v9, %v2502_v34  ;;  %v515_v18 = vpop.f32.mrb[7].mxu0  ;;  %2957 = vmatpush3.bf16.msra.mxu0 %v3686_v27  ;;  %v2524_v27 = vsel %vm3765_vm5, 1.0, %v3485_v26  ;;  %v2521_v3 = vsel %vm3825_vm8, 1.0, %v3485_v26 }
 0x10d   : > { %v3784_v22 = vmax.f32 %v513_v8, 0.0  ;;  %v516_v23 = vadd.f32 %v2502_v34, %v515_v18  ;;  %2958 = vmatprep.subr.bf16.mxu0 %v3349_v63  ;;  %v3829_v45 = vpack.c.bf16 %v2524_v27, %v2523_v21  ;;  %v3355_v8 = vld [vmem:[%s4334_s3 + $0x20] sm:$0xff]   ;;  %v3352_v18 = vld [vmem:[%s4334_s3 + $0x110] sm:$0xff]   ;;  %v3906_v12 = vpack.c.bf16 %v2522_v4, %v2521_v3 }
 0x10e   : > { %545 = vst [vmem:[#allocation2 + $0x40] sm:$0xff] %v3777_v15  ;;  %v3794_v28 = vmax.f32 %v524_v16, 0.0  ;;  %v1149_v31 = vld [vmem:[#allocation2 + $0xf] sm:$0xff]  ;;  %v2529_v21 = vsel %vm3875_vm12, 1.0, %v3485_v26  ;;  %v2526_v27 = vsel %vm3851_vm10, 1.0, %v3485_v26 }
 0x10f   : > { %543 = vst [vmem:[#allocation2 + $0x30] sm:$0xff] %v3784_v22  ;;  %v3804_v34 = vmax.f32 %v516_v23, 0.0  ;;  %v3808_v36 = vld [vmem:[#allocation2 + $0x27] sm:$0xff]  ;;  %v3812_v38 = vpack.c.bf16 %v3784_v22, %v3715_v51  ;;  %v716_v39 = vpack.c.bf16 %v1149_v31, %v708_v19  ;;  %v1918_v19 = vld [vmem:[#allocation2 + $0x51] sm:$0xff]  ;;  %v2530_v23 = vsel %vm3879_vm13, 1.0, %v3485_v26 }
 0x110   : > { %546 = vst [vmem:[#allocation2 + $0x48] sm:$0xff] %v3794_v28  ;;  %v3815_v40 = vld [vmem:[#allocation2 + $0x17] sm:$0xff]  ;;  %v3817_v41 = vld [vmem:[#allocation2 + $0x1f] sm:$0xff]  ;;  %2959 = vmatpush3.bf16.msra.mxu0 %v3349_v63  ;;  %v1314_v46 = vpack.c.bf16 %v3794_v28, %v3777_v15  ;;  %v3959_v9 = vpack.c.bf16 %v2526_v27, %v2525_v56 }
 0x111   : > { %v3833_v47 = vld [vmem:[#allocation2 + $0x21] sm:$0xff]  ;;  %544 = vst [vmem:[#allocation2 + $0x38] sm:$0xff] %v3804_v34  ;;  %v1157_v50 = vpack.c.bf16 %v3815_v40, %v1149_v31  ;;  %v1158_v52 = vpack.c.bf16 %v3808_v36, %v3817_v41  ;;  %2952 = vmatprep.mubr.bf16.mxu0 %v3812_v38  ;;  %2960 = vmatprep.subr.bf16.mxu0 %v3351_v24  ;;  %v3847_v57 = vld [vmem:[#allocation2 + $0x19] sm:$0xff] }
 0x112   : > { %v3842_v54 = vpack.c.bf16 %v3777_v15, %v3804_v34  ;;  %v720_v59 = vmul.bf16 %v716_v39, %v3796_v29  ;;  %v1313_v61 = vpack.c.bf16 %v3804_v34, %v3784_v22  ;;  %v3866_v48 = vpack.c.bf16 %v3833_v47, %v3847_v57  ;;  %v3370_v51 = vld [vmem:[%s4334_s3 + $0x158] sm:$0xff]   ;;  %v3375_v22 = vld [vmem:[%s4334_s3 + $0xb0] sm:$0xff]   ;;  %v3372_v34 = vld [vmem:[%s4334_s3 + $0x160] sm:$0xff]  }
 0x113   : > { %v1161_v63 = vmul.bf16 %v1157_v50, %v3796_v29  ;;  %v1162_v0 = vmul.bf16 %v1158_v52, %v3806_v35  ;;  %v2528_v39 = vsel %vm3893_vm15, 1.0, %v3485_v26  ;;  %v3357_v52 = vld [vmem:[%s4334_s3 + $0x28] sm:$0xff]   ;;  %v3994_v53 = vpack.c.bf16 %v3817_v41, %v3815_v40  ;;  %v996_v41 = vld [vmem:[#allocation2 + $0x11] sm:$0xff] }
 0x114   : > { %2953 = vmatmul.mubr.bf16.gmra.mrb[12].mxu0 %v3842_v54  ;;  %v1923_v11 = vmul.bf16 %v3866_v48, %v3829_v45  ;;  %v3961_v10 = vpack.c.bf16 %v2528_v39, %v2527_v33  ;;  %v3365_v40 = vld [vmem:[%s4334_s3 + $0x88] sm:$0xff]   ;;  %v3362_v39 = vld [vmem:[%s4334_s3 + $0x138] sm:$0xff]  }
 0x115   : > { %2961 = vmatpush3.bf16.msra.mxu0 %v3351_v24  ;;  %2972 = vmatprep.mubr.bf16.mxu0 %v720_v59  ;;  %v3374_v15 = vld [vmem:[%s4334_s3 + $0x168] sm:$0xff]  }
 0x116   : > { %3020 = vmatprep.mubr.bf16.mxu1 %v1161_v63  ;;  %2962 = vmatprep.subr.bf16.mxu0 %v3353_v55  ;;  %v1153_v16 = vld [vmem:[#allocation2 + $0x2f] sm:$0xff] }
 0x117   : > { %3021 = vmatmul.mubr.bf16.vlgmr.msra.gmra.mrb[0].mxu1 %v1162_v0  ;;  %v1156_v20 = vld [vmem:[#allocation2 + $0x47] sm:$0xff]  ;;  %v3935_v58 = vpack.c.bf16 %v1153_v16, %v3808_v36  ;;  %v1614_v4 = vld [vmem:[#allocation2 + $0x4f] sm:$0xff] }
 0x118   : > { %3029 = vmatpush3.bf16.msra.mxu1 %v3698_v30  ;;  %v3914_v24 = vld [vmem:[#allocation2 + $0x41] sm:$0xff]  ;;  %v3916_v25 = vld [vmem:[#allocation2 + $0x49] sm:$0xff]  ;;  %v3921_v30 = vpack.c.bf16 %v2520_v7, %v2519_v37  ;;  %v1154_v31 = vld [vmem:[#allocation2 + $0x37] sm:$0xff]  ;;  %v3947_v37 = vpack.c.bf16 %v2530_v23, %v2529_v21  ;;  %v1618_v21 = vpack.c.bf16 %v1614_v4, %v1156_v20 }
 0x119   : > { %3030 = vmatprep.subr.bf16.mxu1 %v3350_v2  ;;  %v1155_v32 = vld [vmem:[#allocation2 + $0x3f] sm:$0xff]  ;;  %2963 = vmatpush3.bf16.msra.mxu0 %v3353_v55  ;;  %v3929_v42 = vld [vmem:[#allocation2 + $0x31] sm:$0xff]  ;;  %v1159_v43 = vpack.c.bf16 %v1154_v31, %v1153_v16  ;;  %v3939_v59 = vld [vmem:[#allocation2 + $0x29] sm:$0xff]  ;;  %v1922_v36 = vpack.c.bf16 %v1918_v19, %v3916_v25  ;;  %v1620_v16 = vmul.bf16 %v3935_v58, %v3806_v35 }
 0x11a   : > { %v1160_v50 = vpack.c.bf16 %v1156_v20, %v1155_v32  ;;  %2964 = vmatprep.subr.bf16.mxu0 %v3355_v8  ;;  %v3937_v55 = vpack.c.bf16 %v1155_v32, %v1154_v31  ;;  %v3941_v63 = vld [vmem:[#allocation2 + $0x39] sm:$0xff]  ;;  %v3945_v0 = vpack.c.bf16 %v3929_v42, %v3939_v59  ;;  %v3981_v27 = vmul.bf16 %v1618_v21, %v3906_v12 }
 0x11b   : > { %v3951_v3 = vpack.c.bf16 %v3914_v24, %v3941_v63  ;;  %v1163_v5 = vmul.bf16 %v1159_v43, %v3921_v30  ;;  %v3354_v7 = vld [vmem:[%s4334_s3 + $0x118] sm:$0xff]   ;;  %v3975_v23 = vmul.bf16 %v1922_v36, %v3947_v37  ;;  %v3356_v20 = vld [vmem:[%s4334_s3 + $0x120] sm:$0xff]   ;;  %v721_v32 = vmul.bf16 %v3994_v53, %v3806_v35  ;;  %v995_v43 = vld [vmem:[#allocation2 + $0x9] sm:$0xff] }
 0x11c   : > { %3031 = vmatpush3.bf16.msra.mxu1 %v3350_v2  ;;  %v1164_v6 = vmul.bf16 %v1160_v50, %v3906_v12  ;;  %v3359_v2 = vld [vmem:[%s4334_s3 + $0x30] sm:$0xff]   ;;  %v1621_v19 = vmul.bf16 %v3937_v55, %v3921_v30  ;;  %v3361_v31 = vld [vmem:[%s4334_s3 + $0x38] sm:$0xff]   ;;  %v722_v33 = vmul.bf16 %v3935_v58, %v3921_v30  ;;  %v3364_v4 = vld [vmem:[%s4334_s3 + $0x140] sm:$0xff]   ;;  %v723_v36 = vmul.bf16 %v3937_v55, %v3906_v12 }
 0x11d   : > { %3032 = vmatprep.subr.bf16.mxu1 %v3352_v18  ;;  %2965 = vmatpush3.bf16.msra.mxu0 %v3355_v8  ;;  %v1924_v8 = vmul.bf16 %v3945_v0, %v3959_v9  ;;  %v1925_v56 = vmul.bf16 %v3951_v3, %v3961_v10  ;;  %v3367_v50 = vld [vmem:[%s4334_s3 + $0x90] sm:$0xff]   ;;  %v3371_v12 = vld [vmem:[%s4334_s3 + $0xa0] sm:$0xff]   ;;  %v1461_v21 = vpack.c.bf16 %v3847_v57, %v996_v41  ;;  %v3377_v57 = vld [vmem:[%s4334_s3 + $0xb8] sm:$0xff]  }
 0x11e   : > { %3024 = vmatprep.mubr.bf16.mxu1 %v1163_v5  ;;  %2966 = vmatprep.subr.bf16.mxu0 %v3357_v52  ;;  %v3391_v35 = vld [vmem:[%s4334_s3 + $0x1e0] sm:$0xff]   ;;  %v3392_v30 = vld [vmem:[%s4334_s3 + $0x1e8] sm:$0xff]   ;;  %v3393_v58 = vld [vmem:[%s4334_s3 + $0x1f0] sm:$0xff]  }
 0x11f   : > { %3025 = vmatmul.mubr.bf16.gmra.mrb[4].mxu1 %v1164_v6  ;;  %v3369_v6 = vld [vmem:[%s4334_s3 + $0x98] sm:$0xff]   ;;  %v3395_v55 = vld [vmem:[%s4334_s3 + $0x200] sm:$0xff]  }
 0x120   : > { %3033 = vmatpush3.bf16.msra.mxu1 %v3352_v18  ;;  %3044 = vmatprep.mubr.bf16.mxu1 %v1311_v1  ;;  %v3363_v1 = vld [vmem:[%s4334_s3 + $0x80] sm:$0xff]   ;;  %v3360_v18 = vld [vmem:[%s4334_s3 + $0x130] sm:$0xff]  }
 0x121   : > { %3034 = vmatprep.subr.bf16.mxu1 %v3354_v7  ;;  %2967 = vmatpush3.bf16.msra.mxu0 %v3357_v52  ;;  %v1003_v52 = vpack.c.bf16 %v996_v41, %v995_v43  ;;  %v1619_v41 = vmul.bf16 %v3994_v53, %v3796_v29  ;;  %v3385_v29 = vld [vmem:[%s4334_s3 + $0x1b0] sm:$0xff]   ;;  %v3388_v53 = vld [vmem:[%s4334_s3 + $0x1c8] sm:$0xff]   ;;  %v3390_v43 = vld [vmem:[%s4334_s3 + $0x1d8] sm:$0xff]  }
 0x122   : > { %2968 = vmatprep.subr.bf16.mxu0 %v3359_v2 }
 0x123   : > { %v1007_v5 = vmul.bf16 %v1003_v52, %v3829_v45 }
 0x124   : > { %3035 = vmatpush3.bf16.msra.mxu1 %v3354_v7  ;;  %v3366_v7 = vld [vmem:[%s4334_s3 + $0x148] sm:$0xff]  }
 0x125   : > { %3036 = vmatprep.subr.bf16.mxu1 %v3356_v20  ;;  %2969 = vmatpush3.bf16.msra.mxu0 %v3359_v2  ;;  %v3368_v2 = vld [vmem:[%s4334_s3 + $0x150] sm:$0xff]  }
 0x126   : > { %2970 = vmatprep.subr.bf16.mxu0 %v3361_v31 }
 0x128   : > { %3037 = vmatpush3.bf16.msra.mxu1 %v3356_v20  ;;  %v1009_v20 = vmul.bf16 %v3945_v0, %v3961_v10  ;;  %v3404_v0 = vld [vmem:[%s4336_s5] sm:$0xff]  }
 0x129   : > { %3038 = vmatprep.subr.bf16.mxu1 %v3358_v49  ;;  %2971 = vmatpush3.bf16.msra.mxu0 %v3361_v31  ;;  %v3378_v31 = vld [vmem:[%s4334_s3 + $0x178] sm:$0xff]  }
 0x12a   : > { %2980 = vmatprep.subr.bf16.mxu0 %v3363_v1 }
 0x12c   : > { %3039 = vmatpush3.bf16.msra.mxu1 %v3358_v49  ;;  %2973 = vmatmul.mubr.bf16.vlgmr.msra.gmra.mrb[8].mxu0 %v721_v32  ;;  %v3420_v49 = vld [vmem:[%s3607_s21] sm:$0xff]   ;;  %v1463_v32 = vpack.c.bf16 %v3941_v63, %v3929_v42  ;;  %v3381_v42 = vld [vmem:[%s4334_s3 + $0x190] sm:$0xff]   ;;  %v3382_v63 = vld [vmem:[%s4334_s3 + $0x198] sm:$0xff]   ;;  %s352_s21 = scalar_lea.vmem [#allocation3], %s2499_s12 }
 0x12d   : > { %3040 = vmatprep.subr.bf16.mxu1 %v3360_v18  ;;  %2976 = vmatprep.mubr.bf16.mxu0 %v722_v33  ;;  %v1010_v33 = vmul.bf16 %v3951_v3, %v3947_v37  ;;  %v3405_v3 = vld [vmem:[%s4336_s5 + $0x8] sm:$0xff]   ;;  %s2433_s25 = sshll.u32 %s352_s21, 4  ;;  %s4283_s25 = int_to_ptr.vmem [resolvable:$true] %s2433_s25 }
 0x12e   : > { %2981 = vmatpush3.bf16.msra.mxu0 %v3363_v1  ;;  %v1462_v1 = vpack.c.bf16 %v3939_v59, %v3833_v47  ;;  %v3380_v47 = vld [vmem:[%s4334_s3 + $0x188] sm:$0xff]   ;;  %v1467_v59 = vmul.bf16 %v1463_v32, %v3961_v10  ;;  %s3421_s12 = scalar_lea.vmem %s4283_s25, 256  ;;  %p3428_p0 = scmp.lt.s32.totalorder %s4283_s25, %s3426_s18 }
 0x12f   : > { %2982 = vmatprep.subr.bf16.mxu0 %v3365_v40  ;;  %p3422_p11 = scmp.ne.s32.totalorder %s4283_s25, %s3421_s12  ;;  %p3429_p1 = scmp.lt.s32.totalorder %s3427_s20, %s3421_s12 }
 0x130   : > { %3041 = vmatpush3.bf16.msra.mxu1 %v3360_v18  ;;  %v3379_v18 = vld [vmem:[%s4334_s3 + $0x180] sm:$0xff]  }
 0x131   : > { %3042 = vmatprep.subr.bf16.mxu1 %v3362_v39  ;;  %p3423_p12 = pnand %p3422_p11, %p3583_p5  ;;  %p3430_p2 = por %p3429_p1, %p3428_p0 }
 0x132   : > { %2983 = vmatpush3.bf16.msra.mxu0 %v3365_v40  ;;  %v1466_v40 = vmul.bf16 %v1462_v1, %v3959_v9 }
 0x133   : > { %2984 = vmatprep.subr.bf16.mxu0 %v3367_v50  ;;  %p3424_p13 = pneg %p3423_p12 }
 0x134   : > { %3043 = vmatpush3.bf16.msra.mxu1 %v3362_v39  ;;  %2977 = vmatmul.mubr.bf16.gmra.mrb[12].mxu0 %v723_v36  ;;  %v3389_v39 = vld [vmem:[%s4334_s3 + $0x1d0] sm:$0xff]  }
 0x135   : > { %3052 = vmatprep.subr.bf16.mxu1 %v3364_v4  ;;  %2996 = vmatprep.mubr.bf16.mxu0 %v1007_v5  ;;  %v3407_v5 = vld [vmem:[%s4336_s5 + $0x18] sm:$0xff]   ;;  %p3431_p3 = pnand %p3430_p2, %p3424_p13 }
 0x136   : > { %2985 = vmatpush3.bf16.msra.mxu0 %v3367_v50  ;;  %v3398_v50 = vld [vmem:[%s4334_s3 + $0x218] sm:$0xff]  }
 0x137   : > { %3045 = vmatmul.mubr.bf16.vlgmr.msra.gmra.mrb[0].mxu1 %v1312_v60  ;;  %2986 = vmatprep.subr.bf16.mxu0 %v3369_v6  ;;  %v1465_v60 = vmul.bf16 %v1461_v21, %v3829_v45  ;;  %v3402_v45 = vld [vmem:[%s4334_s3 + $0x238] sm:$0xff]   ;;  %v2731_v21 = vld [vmem:[%s4335_s4] ss:$0 sm:$0xff] }
 0x138   : > { %3048 = vmatprep.mubr.bf16.mxu1 %v1313_v61  ;;  %3053 = vmatpush3.bf16.msra.mxu1 %v3364_v4  ;;  %v1008_v61 = vmul.bf16 %v3866_v48, %v3959_v9  ;;  %v4192_v4 = vld [vmem:[%s4340_s9] sm:$0xff]  }
 0x139   : > { %3054 = vmatprep.subr.bf16.mxu1 %v3366_v7 }
 0x13a   : > { %2987 = vmatpush3.bf16.msra.mxu0 %v3369_v6  ;;  %v3408_v6 = vld [vmem:[%s4336_s5 + $0x20] sm:$0xff]  }
 0x13b   : > { %2988 = vmatprep.subr.bf16.mxu0 %v3371_v12 }
 0x13c   : > { %3055 = vmatpush3.bf16.msra.mxu1 %v3366_v7  ;;  %v3409_v7 = vld [vmem:[%s4336_s5 + $0x28] sm:$0xff]  }
 0x13d   : > { %3056 = vmatprep.subr.bf16.mxu1 %v3368_v2 }
 0x13e   : > { %2989 = vmatpush3.bf16.msra.mxu0 %v3371_v12  ;;  %v3410_v12 = vld [vmem:[%s4336_s5 + $0x30] sm:$0xff]  }
 0x13f   : > { %3049 = vmatmul.mubr.bf16.gmra.mrb[4].mxu1 %v1314_v46  ;;  %2990 = vmatprep.subr.bf16.mxu0 %v3373_v44  ;;  %v3376_v46 = vld [vmem:[%s4334_s3 + $0x170] sm:$0xff]  }
 0x140   : > { %3057 = vmatpush3.bf16.msra.mxu1 %v3368_v2  ;;  %3068 = vmatprep.mubr.bf16.mxu1 %v1465_v60 }
 0x141   : > { %3058 = vmatprep.subr.bf16.mxu1 %v3370_v51 }
 0x142   : > { %2991 = vmatpush3.bf16.msra.mxu0 %v3373_v44 }
 0x143   : > { %2992 = vmatprep.subr.bf16.mxu0 %v3375_v22 }
 0x144   : > { %3059 = vmatpush3.bf16.msra.mxu1 %v3370_v51 }
 0x145   : > { %3060 = vmatprep.subr.bf16.mxu1 %v3372_v34 }
 0x146   : > { %2993 = vmatpush3.bf16.msra.mxu0 %v3375_v22 }
 0x147   : > { %2994 = vmatprep.subr.bf16.mxu0 %v3377_v57 }
 0x148   : > { %3061 = vmatpush3.bf16.msra.mxu1 %v3372_v34 }
 0x149   : > { %3062 = vmatprep.subr.bf16.mxu1 %v3374_v15 }
 0x14a   : > { %2995 = vmatpush3.bf16.msra.mxu0 %v3377_v57 }
 0x14b   : > { %3160 = vmatprep.subr.bf16.mxu0 %v3485_v26 }
 0x14c   : > { %3063 = vmatpush3.bf16.msra.mxu1 %v3374_v15 }
 0x14d   : > { %3064 = vmatprep.subr.bf16.mxu1 %v3376_v46  ;;  %2997 = vmatmul.mubr.bf16.vlgmr.msra.gmra.mrb[8].mxu0 %v1008_v61 }
 0x14e   : > { %3000 = vmatprep.mubr.bf16.mxu0 %v1009_v20  ;;  %3161 = vmatpush3.bf16.msra.mxu0 %v3420_v49 }
 0x14f   : > { %3162 = vmatprep.subr.bf16.mxu0 %v3485_v26 }
 0x150   : > { %3065 = vmatpush3.bf16.msra.mxu1 %v3376_v46 }
 0x151   : > { %3066 = vmatprep.subr.bf16.mxu1 %v3378_v31 }
 0x152   : > { %3163 = vmatpush3.bf16.msra.mxu0 %v3638_v13  ;;  %v1464_v13 = vpack.c.bf16 %v3916_v25, %v3914_v24  ;;  %v3384_v24 = vld [vmem:[%s4334_s3 + $0x1a8] sm:$0xff]   ;;  %v3386_v25 = vld [vmem:[%s4334_s3 + $0x1b8] sm:$0xff]  }
 0x153   : > { %3164 = vmatprep.subr.bf16.mxu0 %v3485_v26 }
 0x154   : > { %3067 = vmatpush3.bf16.msra.mxu1 %v3378_v31 }
 0x155   : > { %3076 = vmatprep.subr.bf16.mxu1 %v3379_v18  ;;  %3001 = vmatmul.mubr.bf16.gmra.mrb[12].mxu0 %v1010_v33 }
 0x156   : > { %3165 = vmatpush3.bf16.msra.mxu0 %v3641_v14  ;;  %v1468_v14 = vmul.bf16 %v1464_v13, %v3947_v37  ;;  %v3387_v37 = vld [vmem:[%s4334_s3 + $0x1c0] sm:$0xff]   ;;  %3168 = vmatprep.mubr.msk.bf16.mxu0 %vm3486_vm0, %v3485_v26 }
 0x157   : > { %3069 = vmatmul.mubr.bf16.vlgmr.msra.gmra.mrb[0].mxu1 %v1466_v40  ;;  %3166 = vmatprep.subr.bf16.mxu0 %v3485_v26 }
 0x158   : > { %3072 = vmatprep.mubr.bf16.mxu1 %v1467_v59  ;;  %3077 = vmatpush3.bf16.msra.mxu1 %v3379_v18 }
 0x159   : > { %3078 = vmatprep.subr.bf16.mxu1 %v3380_v47 }
 0x15a   : > { %3167 = vmatpush3.bf16.msra.mxu0 %v3652_v17  ;;  %v3383_v17 = vld [vmem:[%s4334_s3 + $0x1a0] sm:$0xff]  }
 0x15b   : > { %3172 = vmatprep.subr.bf16.mxu0 %v3485_v26 }
 0x15c   : > { %3079 = vmatpush3.bf16.msra.mxu1 %v3380_v47 }
 0x15d   : > { %3080 = vmatprep.subr.bf16.mxu1 %v3381_v42  ;;  %3169 = vmatmul.mubr.msk.bf16.vlgmr.msra.gmra.mrb[16].mxu0 %vm2099_vm1, %v4192_v4 }
 0x15e   : > { %3188 = vmatprep.mubr.msk.bf16.mxu0 %vm3486_vm0, %v3485_v26  ;;  %3173 = vmatpush3.bf16.msra.mxu0 %v3404_v0  ;;  %v3416_v0 = vld [vmem:[%s4338_s7 + $0x20] sm:$0xff]  }
 0x15f   : > { %3073 = vmatmul.mubr.bf16.gmra.mrb[4].mxu1 %v1468_v14  ;;  %3174 = vmatprep.subr.bf16.mxu0 %v3485_v26 }
 0x160   : > { %3081 = vmatpush3.bf16.msra.mxu1 %v3381_v42  ;;  %3092 = vmatprep.mubr.bf16.mxu1 %v1619_v41 }
 0x161   : > { %3082 = vmatprep.subr.bf16.mxu1 %v3382_v63 }
 0x162   : > { %3175 = vmatpush3.bf16.msra.mxu0 %v3405_v3  ;;  %v3417_v3 = vld [vmem:[%s4338_s7 + $0x28] sm:$0xff]  }
 0x163   : > { %3176 = vmatprep.subr.bf16.mxu0 %v3485_v26 }
 0x164   : > { %3083 = vmatpush3.bf16.msra.mxu1 %v3382_v63 }
 0x165   : > { %3084 = vmatprep.subr.bf16.mxu1 %v3383_v17 }
 0x168   : > { %3085 = vmatpush3.bf16.msra.mxu1 %v3383_v17 }
 0x169   : > { %3086 = vmatprep.subr.bf16.mxu1 %v3384_v24 }
 0x16c   : > { %3087 = vmatpush3.bf16.msra.mxu1 %v3384_v24 }
 0x16d   : > { %3088 = vmatprep.subr.bf16.mxu1 %v3385_v29 }
 0x170   : > { %3089 = vmatpush3.bf16.msra.mxu1 %v3385_v29 }
 0x171   : > { %3090 = vmatprep.subr.bf16.mxu1 %v3386_v25 }
 0x174   : > { %3091 = vmatpush3.bf16.msra.mxu1 %v3386_v25 }
 0x175   : > { %3100 = vmatprep.subr.bf16.mxu1 %v3387_v37 }
 0x177   : > { %3093 = vmatmul.mubr.bf16.vlgmr.msra.gmra.mrb[0].mxu1 %v1620_v16  ;;  %v3396_v16 = vld [vmem:[%s4334_s3 + $0x208] sm:$0xff]  }
 0x178   : > { %3096 = vmatprep.mubr.bf16.mxu1 %v1621_v19  ;;  %3101 = vmatpush3.bf16.msra.mxu1 %v3387_v37  ;;  %v3397_v19 = vld [vmem:[%s4334_s3 + $0x210] sm:$0xff]  }
 0x179   : > { %3102 = vmatprep.subr.bf16.mxu1 %v3388_v53 }
 0x17c   : > { %3103 = vmatpush3.bf16.msra.mxu1 %v3388_v53 }
 0x17d   : > { %3104 = vmatprep.subr.bf16.mxu1 %v3389_v39 }
 0x17f   : > { %3097 = vmatmul.mubr.bf16.gmra.mrb[4].mxu1 %v3981_v27  ;;  %v1772_v27 = vpack.c.bf16 %v3485_v26, %v3794_v28  ;;  %v3400_v28 = vld [vmem:[%s4334_s3 + $0x228] sm:$0xff]  }
 0x180   : > { %3105 = vmatpush3.bf16.msra.mxu1 %v3389_v39  ;;  %3116 = vmatprep.mubr.bf16.mxu1 %v3747_v62  ;;  %v3394_v62 = vld [vmem:[%s4334_s3 + $0x1f8] sm:$0xff]  }
 0x181   : > { %3106 = vmatprep.subr.bf16.mxu1 %v3390_v43 }
 0x184   : > { %3107 = vmatpush3.bf16.msra.mxu1 %v3390_v43 }
 0x185   : > { %3108 = vmatprep.subr.bf16.mxu1 %v3391_v35 }
 0x188   : > { %3109 = vmatpush3.bf16.msra.mxu1 %v3391_v35 }
 0x189   : > { %3110 = vmatprep.subr.bf16.mxu1 %v3392_v30 }
 0x18c   : > { %3111 = vmatpush3.bf16.msra.mxu1 %v3392_v30 }
 0x18d   : > { %3112 = vmatprep.subr.bf16.mxu1 %v3393_v58 }
 0x190   : > { %3113 = vmatpush3.bf16.msra.mxu1 %v3393_v58 }
 0x191   : > { %3114 = vmatprep.subr.bf16.mxu1 %v3394_v62 }
 0x194   : > { %3115 = vmatpush3.bf16.msra.mxu1 %v3394_v62  ;;  %v3411_v62 = vld [vmem:[%s4336_s5 + $0x38] sm:$0xff]  }
 0x195   : > { %3124 = vmatprep.subr.bf16.mxu1 %v3395_v55 }
 0x197   : > { %3117 = vmatmul.mubr.bf16.vlgmr.msra.gmra.mrb[0].mxu1 %v3812_v38  ;;  %v3399_v38 = vld [vmem:[%s4334_s3 + $0x220] sm:$0xff]  }
 0x198   : > { %3120 = vmatprep.mubr.bf16.mxu1 %v3842_v54  ;;  %3125 = vmatpush3.bf16.msra.mxu1 %v3395_v55  ;;  %v3401_v54 = vld [vmem:[%s4334_s3 + $0x230] sm:$0xff]  }
 0x199   : > { %3126 = vmatprep.subr.bf16.mxu1 %v3396_v16 }
 0x19c   : > { %3127 = vmatpush3.bf16.msra.mxu1 %v3396_v16 }
 0x19d   : > { %3128 = vmatprep.subr.bf16.mxu1 %v3397_v19 }
 0x19f   : > { %3121 = vmatmul.mubr.bf16.gmra.mrb[4].mxu1 %v1772_v27 }
 0x1a0   : > { %3129 = vmatpush3.bf16.msra.mxu1 %v3397_v19  ;;  %3140 = vmatprep.mubr.bf16.mxu1 %v1923_v11 }
 0x1a1   : > { %3130 = vmatprep.subr.bf16.mxu1 %v3398_v50 }
 0x1a4   : > { %3131 = vmatpush3.bf16.msra.mxu1 %v3398_v50 }
 0x1a5   : > { %3132 = vmatprep.subr.bf16.mxu1 %v3399_v38 }
 0x1a8   : > { %3133 = vmatpush3.bf16.msra.mxu1 %v3399_v38 }
 0x1a9   : > { %3134 = vmatprep.subr.bf16.mxu1 %v3400_v28 }
 0x1ac   : > { %3135 = vmatpush3.bf16.msra.mxu1 %v3400_v28 }
 0x1ad   : > { %3136 = vmatprep.subr.bf16.mxu1 %v3401_v54 }
 0x1b0   : > { %3137 = vmatpush3.bf16.msra.mxu1 %v3401_v54 }
 0x1b1   : > { %3138 = vmatprep.subr.bf16.mxu1 %v3402_v45 }
 0x1b4   : > { %3139 = vmatpush3.bf16.msra.mxu1 %v3402_v45  ;;  %v3412_v45 = vld [vmem:[%s4338_s7] sm:$0xff]  }
 0x1b5   : > { %3148 = vmatprep.subr.bf16.mxu1 %v3485_v26 }
 0x1b7   : > { %3141 = vmatmul.mubr.bf16.vlgmr.msra.gmra.mrb[0].mxu1 %v1924_v8 }
 0x1b8   : > { %3144 = vmatprep.mubr.bf16.mxu1 %v1925_v56 }
 0x1bf   : > { %3145 = vmatmul.mubr.bf16.gmra.mrb[4].mxu1 %v3975_v23  ;;  %v3406_v23 = vld [vmem:[%s4336_s5 + $0x10] sm:$0xff]  }
 0x1c0   : > { %3156 = vmatprep.mubr.msk.bf16.mxu1 %vm3486_vm0, %v3485_v26  ;;  %3177 = vmatpush3.bf16.msra.mxu0 %v3406_v23 }
 0x1c1   : > { %3178 = vmatprep.subr.bf16.mxu0 %v3485_v26 }
 0x1c4   : > { %3179 = vmatpush3.bf16.msra.mxu0 %v3407_v5 }
 0x1c5   : > { %3180 = vmatprep.subr.bf16.mxu0 %v3485_v26 }
 0x1c8   : > { %3181 = vmatpush3.bf16.msra.mxu0 %v3408_v6  ;;  %v2735_v6 = vld [vmem:[%s4337_s6] ss:$0 sm:$0xff] }
 0x1c9   : > { %3182 = vmatprep.subr.bf16.mxu0 %v3485_v26 }
 0x1cc   : > { %3183 = vmatpush3.bf16.msra.mxu0 %v3409_v7 }
 0x1cd   : > { %3184 = vmatprep.subr.bf16.mxu0 %v3485_v26 }
 0x1d0   : > { %3185 = vmatpush3.bf16.msra.mxu0 %v3410_v12 }
 0x1d1   : > { %3186 = vmatprep.subr.bf16.mxu0 %v3485_v26 }
 0x1d4   : > { %3187 = vmatpush3.bf16.msra.mxu0 %v3411_v62 }
 0x1d5   : > { %3192 = vmatprep.subr.bf16.mxu0 %v3485_v26 }
 0x220   : > { %v2998_v48 = vpop.f32.mrb[8].mxu0 }
 0x221   : > { %v1110_v11 = vpop.f32.mrb[9].mxu0 }
 0x222   : > { %v2999_v52 = vpop.f32.mrb[10].mxu0 }
 0x223   : > { %v1113_v36 = vpop.f32.mrb[11].mxu0 }
 0x228   : > { %v3002_v9 = vpop.f32.mrb[12].mxu0 }
 0x229   : > { %v1126_v10 = vpop.f32.mrb[13].mxu0 }
 0x22a   : > { %v3003_v8 = vpop.f32.mrb[14].mxu0 }
 0x22b   : > { %v1129_v56 = vpop.f32.mrb[15].mxu0 }
 0x230   : > { %v2179_v55 = vpop.f32.mrb[16].mxu0 }
 0x231   : > { %v3170_v16 = vpop.f32.mrb[17].mxu0 }
 0x232   : > { %v2182_v19 = vpop.f32.mrb[18].mxu0 }
 0x233   : > { %v2186_v27 = vpack.c.bf16 %v2182_v19, %v2179_v55  ;;  %v3171_v50 = vpop.f32.mrb[19].mxu0 }
 0x28a   : > { %v3142_v2 = vpop.f32.mrb[0].mxu1 }
 0x28b   : > { %v3212_v44 = vadd.f32 %v3142_v2, %v2998_v48  ;;  %v2026_v51 = vpop.f32.mrb[1].mxu1  ;;  %v2752_v2 = vld [vmem:[%s4339_s8] ss:$0 sm:$0xff] }
 0x28c   : > { %v3213_v60 = vadd.f32 %v2026_v51, %v1110_v11  ;;  %v3143_v22 = vpop.f32.mrb[2].mxu1 }
 0x28d   : > { %v2074_v34 = vadd.f32 %v3212_v44, %v2731_v21  ;;  %v3214_v57 = vadd.f32 %v3143_v22, %v2999_v52  ;;  %v2029_v15 = vpop.f32.mrb[3].mxu1  ;;  %v3413_v52 = vld [vmem:[%s4338_s7 + $0x8] sm:$0xff]  }
 0x28e   : > { %v2072_v46 = vadd.f32 %v3213_v60, %v2731_v21  ;;  %v3215_v61 = vadd.f32 %v2029_v15, %v1113_v36  ;;  %v3415_v36 = vld [vmem:[%s4338_s7 + $0x18] sm:$0xff]  }
 0x28f   : > { %v2075_v20 = vadd.f32 %v3214_v57, %v2731_v21  ;;  %v2082_v49 = vmax.f32 %v2074_v34, 0.0 }
 0x290   : > { %v2073_v31 = vadd.f32 %v3215_v61, %v2731_v21  ;;  %v2080_v18 = vmax.f32 %v2072_v46, 0.0 }
 0x291   : > { %v2083_v1 = vmax.f32 %v2075_v20, 0.0 }
 0x292   : > { %v2081_v32 = vmax.f32 %v2073_v31, 0.0  ;;  %v3146_v33 = vpop.f32.mrb[4].mxu1 }
 0x293   : > { %v2091_v40 = vpack.c.bf16 %v2083_v1, %v2082_v49  ;;  %v3216_v47 = vadd.f32 %v3146_v33, %v3002_v9  ;;  %v2042_v59 = vpop.f32.mrb[5].mxu1  ;;  %v3418_v9 = vld [vmem:[%s4338_s7 + $0x30] sm:$0xff]  }
 0x294   : > { %v2090_v13 = vpack.c.bf16 %v2081_v32, %v2080_v18  ;;  %v3217_v42 = vadd.f32 %v2042_v59, %v1126_v10  ;;  %v3147_v14 = vpop.f32.mrb[6].mxu1  ;;  %v3419_v10 = vld [vmem:[%s4338_s7 + $0x38] sm:$0xff]  }
 0x295   : > { %v2078_v63 = vadd.f32 %v3216_v47, %v2731_v21  ;;  %v3218_v41 = vadd.f32 %v3147_v14, %v3003_v8  ;;  %v2045_v17 = vpop.f32.mrb[7].mxu1 }
 0x296   : > { %v2076_v24 = vadd.f32 %v3217_v42, %v2731_v21  ;;  %v3219_v29 = vadd.f32 %v2045_v17, %v1129_v56  ;;  %3149 = vmatpush3.bf16.msra.mxu1 %v2090_v13 }
 0x297   : > { %v2079_v25 = vadd.f32 %v3218_v41, %v2731_v21  ;;  %3150 = vmatprep.subr.bf16.mxu1 %v3485_v26  ;;  %v2086_v53 = vmax.f32 %v2078_v63, 0.0 }
 0x298   : > { %v2077_v37 = vadd.f32 %v3219_v29, %v2731_v21  ;;  %v2084_v43 = vmax.f32 %v2076_v24, 0.0 }
 0x299   : > { %v2087_v39 = vmax.f32 %v2079_v25, 0.0 }
 0x29a   : > { %v2085_v35 = vmax.f32 %v2077_v37, 0.0  ;;  %3151 = vmatpush3.bf16.msra.mxu1 %v2091_v40 }
 0x29b   : > { %v2093_v30 = vpack.c.bf16 %v2087_v39, %v2086_v53  ;;  %3152 = vmatprep.subr.bf16.mxu1 %v3485_v26 }
 0x29c   : > { %v2092_v58 = vpack.c.bf16 %v2085_v35, %v2084_v43 }
 0x29e   : > { %3153 = vmatpush3.bf16.msra.mxu1 %v2092_v58 }
 0x29f   : > { %3154 = vmatprep.subr.bf16.mxu1 %v3485_v26 }
 0x2a2   : > { %3155 = vmatpush3.bf16.msra.mxu1 %v2093_v30 }
 0x2a5   : > { %3157 = vmatmul.mubr.msk.bf16.vlgmr.msra.gmra.mrb[8].mxu1 %vm2099_vm1, %v4192_v4  ;;  %v3414_v4 = vld [vmem:[%s4338_s7 + $0x10] sm:$0xff]  }
 0x378   : > { %v2137_v38 = vpop.f32.mrb[8].mxu1 }
 0x379   : > { %v3158_v28 = vpop.f32.mrb[9].mxu1 }
 0x37a   : > { %v2140_v54 = vpop.f32.mrb[10].mxu1 }
 0x37b   : > { %v2144_v48 = vpack.c.bf16 %v2140_v54, %v2137_v38  ;;  %v3159_v11 = vpop.f32.mrb[11].mxu1 }
 0x37d   : > { %3189 = vmatmul.mubr.bf16.vlgmr.msra.gmra.mrb[20].mxu0 %v2144_v48 }
 0x37e   : > { %3193 = vmatpush3.bf16.msra.mxu0 %v3412_v45  ;;  %3208 = vmatprep.mubr.msk.bf16.mxu0 %vm3486_vm0, %v3485_v26 }
 0x37f   : > { %3194 = vmatprep.subr.bf16.mxu0 %v3485_v26 }
 0x382   : > { %3195 = vmatpush3.bf16.msra.mxu0 %v3413_v52 }
 0x383   : > { %3196 = vmatprep.subr.bf16.mxu0 %v3485_v26 }
 0x386   : > { %3197 = vmatpush3.bf16.msra.mxu0 %v3414_v4 }
 0x387   : > { %3198 = vmatprep.subr.bf16.mxu0 %v3485_v26 }
 0x38a   : > { %3199 = vmatpush3.bf16.msra.mxu0 %v3415_v36 }
 0x38b   : > { %3200 = vmatprep.subr.bf16.mxu0 %v3485_v26 }
 0x38e   : > { %3201 = vmatpush3.bf16.msra.mxu0 %v3416_v0 }
 0x38f   : > { %3202 = vmatprep.subr.bf16.mxu0 %v3485_v26 }
 0x392   : > { %3203 = vmatpush3.bf16.msra.mxu0 %v3417_v3 }
 0x393   : > { %3204 = vmatprep.subr.bf16.mxu0 %v3485_v26 }
 0x396   : > { %3205 = vmatpush3.bf16.msra.mxu0 %v3418_v9 }
 0x397   : > { %3206 = vmatprep.subr.bf16.mxu0 %v3485_v26 }
 0x39a   : > { %3207 = vmatpush3.bf16.msra.mxu0 %v3419_v10 }
 0x39d   : > { %3209 = vmatmul.mubr.bf16.vlgmr.msra.gmra.mrb[24].mxu0 %v2186_v27 }
 0x450   : > { %v2292_v8 = vpop.f32.mrb[20].mxu0 }
 0x451   : > { %v3190_v56 = vpop.f32.mrb[21].mxu0  ;;  %v2293_v7 = vadd.f32 %v2735_v6, %v2292_v8 }
 0x452   : > { %v2295_v23 = vpop.f32.mrb[22].mxu0 }
 0x453   : > { %v3191_v5 = vpop.f32.mrb[23].mxu0  ;;  %v2296_v26 = vadd.f32 %v2735_v6, %v2295_v23 }
 0x470   : > { %v2397_v12 = vpop.f32.mrb[24].mxu0 }
 0x471   : > { %v2404_v21 = vadd.f32 %v2397_v12, %v2293_v7  ;;  %v3210_v44 = vpop.f32.mrb[25].mxu0 }
 0x472   : > { %v2400_v51 = vpop.f32.mrb[26].mxu0 }
 0x473   : > { %v2413_v60 = vadd.f32 %v2752_v2, %v2404_v21  ;;  %v2405_v22 = vadd.f32 %v2400_v51, %v2296_v26  ;;  %v3211_v34 = vpop.f32.mrb[27].mxu0 }
 0x475   : > { %v2415_v57 = vmax.f32 %v2413_v60, 0.0  ;;  %v2414_v15 = vadd.f32 %v2752_v2, %v2405_v22 }
 0x477   : > { %2417 = vst [vmem:[%s352_s21] sm:$0xff] %v2415_v57  ;;  %v2416_v46 = vmax.f32 %v2414_v15, 0.0 }
 0x479   : > { %2418 = vst [vmem:[%s352_s21 + $0x8] sm:$0xff] %v2416_v46 }
 0x47a   : > { %3434 = shalt.err (!%p3431_p3)
}
 0x47b   : > { %s3435_s29 = scalar_lea.hbm %s4288_s30, 256  ;;  %s3439_s27 = scalar_lea.hbm %s4341_s10, 512 }
 0x47c   : > { %p3436_p4 = scmp.ne.s32.totalorder %s4288_s30, %s3435_s29  ;;  %p3440_p9 = scmp.lt.u32.totalorder %s4288_s30, %s4341_s10 }
 0x47d   : > { %p3441_p10 = scmp.lt.u32.totalorder %s3439_s27, %s3435_s29  ;;  %p3443_p12 = scmp.lt.u32.totalorder %s3435_s29, %s4288_s30 }
 0x47e   : > { %p3437_p7 = pnand %p3436_p4, %p3583_p5 }
 0x47f   : > { %p3442_p11 = por %p3441_p10, %p3440_p9 }
 0x480   : > { %p3438_p8 = pneg %p3437_p7 }
 0x481   : > { %p3444_p13 = por %p3443_p12, %p3442_p11 }
 0x483   : > { %p3445_p0 = pnand %p3444_p13, %p3438_p8 }
 0x485   : > { %3448 = shalt.err (!%p3445_p0)
}
 0x486   : > { %s3488_s12 = smov 128   ;;  %s3489_s18 = smov 8  }
 0x487   : > { %3276 = dma.vmem_to_hbm [thread:$0]  (%p3583_p5), %s4283_s25, 256, %s4288_s30, %s4290_s11, %s3488_s12, %s3488_s12, %s3489_s18  }
 0x488 PF: > { %p3282_p1 = scmp.ge.s32.totalorder %s3483_s16, 2  ;;  %s2448_s20 = sand.u32 1, %s3471_s13  }
 0x489   : > { %s2449_s29 = scalar_lea.sflag [#allocation4], %s2448_s20 }
 0x48a   : > { %p3279_p2 = pnand %p3282_p1, %p3587_p6 }
 0x48c   : > { %3466 = dma.done.wait (!%p3279_p2), %s2449_s29, 256  }
 0x48d   : > { %3468 = vsyncadd (!%p3279_p2), %s2449_s29, 4294967040  ;;  %p20_p3 = scmp.ge.s32.totalorder %s3570_s19, 4   ;;  %s4370_s13 = smov %s3475_s14 }
 0x48e   : > { %s4371_s14 = smov %s3479_s15  ;;  %s4372_s15 = smov %s3581_s22 }
 0x48f   : > { %s4373_s16 = smov %s3570_s19  ;;  %22 = sbr.rel (!%p20_p3) target bundleno = 3 (0x3), region = 103 }
 0x496   :  { %2454 = vsyncpa [#allocation4], 1 }
 0x497   :  { %2456 = vsyncpa [#allocation4 + $0x1], 1 }

</bundles_post_ra>
